<compile_context>
chip_gen: v7x
topology: tpu7x:2x2x1
jax: 0.10.0
libtpu: 0.0.40
codegen_flags: <defaults>
</compile_context>

<pallas_src>
import functools

import jax
import jax.numpy as jnp
from jax.experimental import pallas as pl
from jax.experimental.pallas import tpu as pltpu


def _conv_bn_stats_kernel(x_ref, w_ref, y_ref, stats_ref, *,
                          KH, KW, OW, C, OC, tm_rows, stride, dilation):
    """One grid step = one (image, row-tile): a single folded im2col matmul plus
    per-tile BatchNorm partial statistics (sum / sum-of-squares)."""
    m = pl.program_id(1)
    TM = tm_rows * OW
    band_rows = (tm_rows - 1) * stride + (KH - 1) * dilation + 1

    # Row band of the padded bf16 image needed by this tile (kept bf16).
    band = x_ref[0, pl.ds(m * (tm_rows * stride), band_rows), :, :]

    # im2col lhs: concatenate the KH*KW shifted windows along the channel axis
    # -> one MXU contraction of depth KH*KW*C instead of KH*KW depth-C dots.
    # NOTE: stride > 1 relies on strided value slicing (best-effort path).
    taps = []
    for kh in range(KH):
        for kw in range(KW):
            h0 = kh * dilation
            w0 = kw * dilation
            win = band[h0:h0 + (tm_rows - 1) * stride + 1:stride,
                       w0:w0 + (OW - 1) * stride + 1:stride, :]  # (tm_rows, OW, C)
            taps.append(win.reshape(TM, C))
    lhs = jnp.concatenate(taps, axis=-1)                         # (TM, KH*KW*C) bf16

    acc = jnp.dot(lhs, w_ref[...],
                  preferred_element_type=jnp.float32)            # (TM, OC_pad) f32

    # Per-tile BN partial statistics from the f32 accumulator (weight pad
    # columns are zero, so the padded stat lanes are zero too).
    stats_ref[0, 0, 0:1, :] = jnp.sum(acc, axis=0, keepdims=True)
    stats_ref[0, 0, 1:2, :] = jnp.sum(acc * acc, axis=0, keepdims=True)

    # Channel-major bf16 intermediate: transpose to (OC_pad, TM) on the XLU,
    # drop the padded channels, store lane-dense along M.
    y_ref[0] = jnp.transpose(acc)[:OC].astype(y_ref.dtype)


def _bn_apply_kernel(y_ref, scale_ref, shift_ref, o_ref):
    # Purely elementwise: y * scale + shift, per-channel scale/shift broadcast
    # along the lane (M) axis. Output is already NCHW-flat.
    o_ref[0] = y_ref[0].astype(jnp.float32) * scale_ref[0] + shift_ref[0]


def _choose_tile_rows(OH, OW, C, KH, KW, OC, OC_pad, stride, dilation,
                      budget_bytes=12 << 20):
    """Largest row-tile (a divisor of OH) whose M lane-dim is 128-aligned (or
    the whole image) and whose per-tile VMEM footprint stays under budget."""
    K = KH * KW * C

    def tile_bytes(rows):
        tm = rows * OW
        band_rows = (rows - 1) * stride + (KH - 1) * dilation + 1
        band_cols = (OW - 1) * stride + (KW - 1) * dilation + 1
        return (band_rows * band_cols * C * 2   # row band temp
                + 2 * tm * K * 2                # taps + concatenated lhs (bf16)
                + 3 * tm * OC_pad * 4           # f32 acc + transpose temporaries
                + 4 * OC * tm * 2)              # double-buffered bf16 y block

    divisors = [d for d in range(1, OH + 1) if OH % d == 0]
    aligned = [d for d in divisors if (d * OW) % 128 == 0 or d == OH]
    fitting = [d for d in aligned if tile_bytes(d) <= budget_bytes]
    if fitting:
        return max(fitting)
    return min(aligned)


def basic_conv2d(x_nchw, weight_oihw, gamma, beta, *, stride=1, padding=0,
                 dilation=1, eps=1e-5):
    N, C, H, W = x_nchw.shape
    OC, _, KH, KW = weight_oihw.shape
    OH = (H + 2 * padding - dilation * (KH - 1) - 1) // stride + 1
    OW = (W + 2 * padding - dilation * (KW - 1) - 1) // stride + 1
    M_img = OH * OW
    OC_pad = ((OC + 127) // 128) * 128   # MXU-side lane padding only (not persisted)
    K = KH * KW * C

    # TODO(synk): fold the NCHW->NHWC transpose + bf16 cast + spatial pad into
    # the conv kernel (DMA raw rows into a pre-zeroed VMEM scratch) to remove
    # these host-side HBM passes over the input.
    x = jnp.transpose(x_nchw, (0, 2, 3, 1)).astype(jnp.bfloat16)
    x = jnp.pad(x, ((0, 0), (padding, padding), (padding, padding), (0, 0)))
    Hp, Wp = H + 2 * padding, W + 2 * padding

    # (OC, C, KH, KW) -> (KH*KW*C, OC_pad) bf16: one folded contraction axis,
    # tap-major / channel-minor to match the in-kernel lhs concatenation order.
    w = jnp.transpose(weight_oihw, (2, 3, 1, 0)).reshape(K, OC)
    w = jnp.pad(w, ((0, 0), (0, OC_pad - OC))).astype(jnp.bfloat16)

    tm_rows = _choose_tile_rows(OH, OW, C, KH, KW, OC, OC_pad, stride, dilation)
    assert OH % tm_rows == 0
    TM = tm_rows * OW
    M_tiles = OH // tm_rows
    band_rows = (tm_rows - 1) * stride + (KH - 1) * dilation + 1

    conv_kernel = functools.partial(
        _conv_bn_stats_kernel, KH=KH, KW=KW, OW=OW, C=C, OC=OC,
        tm_rows=tm_rows, stride=stride, dilation=dilation)

    conv_vmem_est = (2 * Hp * Wp * C * 2          # image block (double buffered)
                     + 2 * K * OC_pad * 2         # weights (double buffered)
                     + 4 * OC * TM * 2            # y out blocks
                     + 4 * 2 * OC_pad * 4         # stats out blocks
                     + band_rows * Wp * C * 2     # row band temp
                     + 2 * TM * K * 2             # taps + lhs
                     + 3 * TM * OC_pad * 4)       # acc + transpose temps
    conv_vmem = int(min(max(2 * conv_vmem_est, 32 << 20), 64 << 20))

    conv_flops = 2 * N * M_img * K * OC_pad
    conv_bytes = (N * Hp * Wp * C * 2 + K * OC_pad * 2
                  + N * OC * M_img * 2 + N * M_tiles * 2 * OC_pad * 4)

    # Pass 1: folded conv matmul + per-tile BN partial statistics.
    y, stats = pl.pallas_call(
        conv_kernel,
        out_shape=(jax.ShapeDtypeStruct((N, OC, M_img), jnp.bfloat16),
                   jax.ShapeDtypeStruct((N, M_tiles, 2, OC_pad), jnp.float32)),
        grid=(N, M_tiles),
        in_specs=[pl.BlockSpec((1, Hp, Wp, C), lambda n, m: (n, 0, 0, 0)),
                  pl.BlockSpec((K, OC_pad), lambda n, m: (0, 0))],
        out_specs=(pl.BlockSpec((1, OC, TM), lambda n, m: (n, 0, m)),
                   pl.BlockSpec((1, 1, 2, OC_pad), lambda n, m: (n, m, 0, 0))),
        compiler_params=pltpu.CompilerParams(
            dimension_semantics=("parallel", "parallel"),
            vmem_limit_bytes=conv_vmem),
        cost_estimate=pl.CostEstimate(flops=conv_flops, transcendentals=0,
                                      bytes_accessed=conv_bytes),
    )(x, w)

    # BatchNorm2d training-mode statistics (biased variance) from the per-tile
    # partials; the tiny (N*M_tiles, OC) reduction runs outside the kernel.
    m_total = float(N * M_img)
    s = jnp.sum(stats[:, :, 0, :OC], axis=(0, 1))
    sq = jnp.sum(stats[:, :, 1, :OC], axis=(0, 1))
    mean = s / m_total
    var = jnp.maximum(sq / m_total - mean * mean, 0.0)
    inv = gamma.astype(jnp.float32) / jnp.sqrt(var + eps)
    scale = inv.reshape(1, OC, 1)
    shift = (beta.astype(jnp.float32) - mean * inv).reshape(1, OC, 1)

    apply_vmem_est = 4 * OC * TM * (2 + 4) + 4 * OC * 4 * 2
    apply_vmem = int(min(max(2 * apply_vmem_est, 32 << 20), 64 << 20))

    # Pass 2: elementwise normalization, channel-major in / channel-major out.
    out = pl.pallas_call(
        _bn_apply_kernel,
        out_shape=jax.ShapeDtypeStruct((N, OC, M_img), jnp.float32),
        grid=(N, M_tiles),
        in_specs=[pl.BlockSpec((1, OC, TM), lambda n, m: (n, 0, m)),
                  pl.BlockSpec((1, OC, 1), lambda n, m: (0, 0, 0)),
                  pl.BlockSpec((1, OC, 1), lambda n, m: (0, 0, 0))],
        out_specs=pl.BlockSpec((1, OC, TM), lambda n, m: (n, 0, m)),
        compiler_params=pltpu.CompilerParams(
            dimension_semantics=("parallel", "parallel"),
            vmem_limit_bytes=apply_vmem),
        cost_estimate=pl.CostEstimate(
            flops=2 * N * OC * M_img, transcendentals=0,
            bytes_accessed=N * OC * M_img * (2 + 4) + 4 * OC * 4),
    )(y, scale, shift)

    # (N, OC, OH*OW) -> (N, OC, OH, OW): metadata-only reshape, no HBM pass.
    return out.reshape(N, OC, OH, OW)


def _reference(x_nchw, weight_oihw, gamma, beta, *, stride, padding, dilation,
               eps=1e-5, quantize_y=False):
    y = jax.lax.conv_general_dilated(
        x_nchw.astype(jnp.float32), weight_oihw.astype(jnp.float32),
        window_strides=(stride, stride),
        padding=[(padding, padding), (padding, padding)],
        rhs_dilation=(dilation, dilation),
        dimension_numbers=("NCHW", "OIHW", "NCHW"),
        precision=jax.lax.Precision.HIGHEST)
    mean = jnp.mean(y, axis=(0, 2, 3), keepdims=True)
    var = jnp.mean((y - mean) ** 2, axis=(0, 2, 3), keepdims=True)
    if quantize_y:
        y = y.astype(jnp.bfloat16).astype(jnp.float32)
    inv = gamma.reshape(1, -1, 1, 1) / jnp.sqrt(var + eps)
    return y * inv + (beta.reshape(1, -1, 1, 1) - mean * inv)


if __name__ == "__main__":
    # BasicConv2d(in_planes=4, out_planes=8, kernel_size=3, stride=1, padding=1)
    N, C, H, W = 2, 4, 16, 16
    OC, KH, KW = 8, 3, 3
    stride, padding, dilation = 1, 1, 1

    key = jax.random.PRNGKey(0)
    kx, kwt = jax.random.split(key)
    x = jax.random.normal(kx, (N, C, H, W), dtype=jnp.float32)

    # Conv2d default init: U(-bound, bound), bound = 1/sqrt(fan_in)
    bound = 1.0 / (C * KH * KW) ** 0.5
    weight = jax.random.uniform(kwt, (OC, C, KH, KW), dtype=jnp.float32,
                                minval=-bound, maxval=bound)
    # BatchNorm2d default init
    gamma = jnp.ones((OC,), jnp.float32)
    beta = jnp.zeros((OC,), jnp.float32)

    out = basic_conv2d(x, weight, gamma, beta,
                       stride=stride, padding=padding, dilation=dilation)
    out = jax.block_until_ready(out)
    assert out.shape == (N, OC, H, W), out.shape

    # Tight check: reference mirrors the kernel's roundings (bf16 conv operands,
    # bf16 intermediate y); residuals are accumulation/stat summation order plus
    # rare one-ULP bf16 boundary flips on y.
    x_r = x.astype(jnp.bfloat16).astype(jnp.float32)
    w_r = weight.astype(jnp.bfloat16).astype(jnp.float32)
    ref_bf = _reference(x_r, w_r, gamma, beta, stride=stride, padding=padding,
                        dilation=dilation, quantize_y=True)
    err_bf = float(jnp.max(jnp.abs(out - ref_bf)))
    assert jnp.allclose(out, ref_bf, rtol=1e-2, atol=1e-2), err_bf

    # Loose sanity check vs. the full-f32 reference (bf16 rounding only).
    ref_f32 = _reference(x, weight, gamma, beta, stride=stride,
                         padding=padding, dilation=dilation)
    err_f32 = float(jnp.max(jnp.abs(out - ref_f32)))
    assert jnp.allclose(out, ref_f32, rtol=5e-2, atol=5e-2), err_f32

    print("KERNEL_OK")
</pallas_src>

<mosaic_0001>
module attributes {stable_mosaic.version = 11 : i64} {
  func.func @_conv_bn_stats_kernel(%arg0: i32, %arg1: i32, %arg2: memref<1x18x18x4xbf16, #tpu.memory_space<vmem>>, %arg3: memref<36x128xbf16, #tpu.memory_space<vmem>>, %arg4: memref<1x8x256xbf16, #tpu.memory_space<vmem>>, %arg5: memref<1x1x2x128xf32, #tpu.memory_space<vmem>>) attributes {dimension_semantics = [#tpu.dimension_semantics<parallel>, #tpu.dimension_semantics<parallel>], iteration_bounds = array<i64: 2, 1>, scalar_prefetch = 0 : i64, scratch_operands = 0 : i64, tpu.core_type = #tpu.core_type<tc>, window_params = [{transform_indices = @transform_0, window_bounds = array<i64: 1, 18, 18, 4>}, {pipeline_mode = #tpu.pipeline_mode<synchronous>, transform_indices = @transform_1, window_bounds = array<i64: 36, 128>}, {transform_indices = @transform_2, window_bounds = array<i64: 1, 8, 256>}, {transform_indices = @transform_3, window_bounds = array<i64: 1, 1, 2, 128>}]} {
    %c16_i32 = arith.constant 16 : i32
    %0 = arith.muli %arg1, %c16_i32 : i32
    %c0 = arith.constant 0 : index
    %1 = arith.index_cast %0 : i32 to index
    %c0_0 = arith.constant 0 : index
    %c0_1 = arith.constant 0 : index
    %2 = vector.load %arg2[%c0, %1, %c0_0, %c0_1] : memref<1x18x18x4xbf16, #tpu.memory_space<vmem>>, vector<1x18x18x4xbf16>
    %3 = vector.shape_cast %2 : vector<1x18x18x4xbf16> to vector<18x18x4xbf16>
    %4 = vector.extract_strided_slice %3 {offsets = [0, 0, 0], sizes = [16, 16, 4], strides = [1, 1, 1]} : vector<18x18x4xbf16> to vector<16x16x4xbf16>
    %5 = vector.shape_cast %4 : vector<16x16x4xbf16> to vector<256x4xbf16>
    %6 = vector.extract_strided_slice %3 {offsets = [0, 1, 0], sizes = [16, 16, 4], strides = [1, 1, 1]} : vector<18x18x4xbf16> to vector<16x16x4xbf16>
    %7 = vector.shape_cast %6 : vector<16x16x4xbf16> to vector<256x4xbf16>
    %8 = vector.extract_strided_slice %3 {offsets = [0, 2, 0], sizes = [16, 16, 4], strides = [1, 1, 1]} : vector<18x18x4xbf16> to vector<16x16x4xbf16>
    %9 = vector.shape_cast %8 : vector<16x16x4xbf16> to vector<256x4xbf16>
    %10 = vector.extract_strided_slice %3 {offsets = [1, 0, 0], sizes = [16, 16, 4], strides = [1, 1, 1]} : vector<18x18x4xbf16> to vector<16x16x4xbf16>
    %11 = vector.shape_cast %10 : vector<16x16x4xbf16> to vector<256x4xbf16>
    %12 = vector.extract_strided_slice %3 {offsets = [1, 1, 0], sizes = [16, 16, 4], strides = [1, 1, 1]} : vector<18x18x4xbf16> to vector<16x16x4xbf16>
    %13 = vector.shape_cast %12 : vector<16x16x4xbf16> to vector<256x4xbf16>
    %14 = vector.extract_strided_slice %3 {offsets = [1, 2, 0], sizes = [16, 16, 4], strides = [1, 1, 1]} : vector<18x18x4xbf16> to vector<16x16x4xbf16>
    %15 = vector.shape_cast %14 : vector<16x16x4xbf16> to vector<256x4xbf16>
    %16 = vector.extract_strided_slice %3 {offsets = [2, 0, 0], sizes = [16, 16, 4], strides = [1, 1, 1]} : vector<18x18x4xbf16> to vector<16x16x4xbf16>
    %17 = vector.shape_cast %16 : vector<16x16x4xbf16> to vector<256x4xbf16>
    %18 = vector.extract_strided_slice %3 {offsets = [2, 1, 0], sizes = [16, 16, 4], strides = [1, 1, 1]} : vector<18x18x4xbf16> to vector<16x16x4xbf16>
    %19 = vector.shape_cast %18 : vector<16x16x4xbf16> to vector<256x4xbf16>
    %20 = vector.extract_strided_slice %3 {offsets = [2, 2, 0], sizes = [16, 16, 4], strides = [1, 1, 1]} : vector<18x18x4xbf16> to vector<16x16x4xbf16>
    %21 = vector.shape_cast %20 : vector<16x16x4xbf16> to vector<256x4xbf16>
    %22 = tpu.concatenate %5, %7, %9, %11, %13, %15, %17, %19, %21 in 1 : vector<256x4xbf16>, vector<256x4xbf16>, vector<256x4xbf16>, vector<256x4xbf16>, vector<256x4xbf16>, vector<256x4xbf16>, vector<256x4xbf16>, vector<256x4xbf16>, vector<256x4xbf16> -> vector<256x36xbf16>
    %c0_2 = arith.constant 0 : index
    %c0_3 = arith.constant 0 : index
    %23 = vector.load %arg3[%c0_2, %c0_3] : memref<36x128xbf16, #tpu.memory_space<vmem>>, vector<36x128xbf16>
    %cst = arith.constant dense<0.000000e+00> : vector<256x128xf32>
    %24 = tpu.matmul %22, %23, %cst {dimension_numbers = #tpu.dot_dimension_numbers<[1], [0], [0], [1], [0, 0, 1, 1], [], []>} : vector<256x36xbf16>, vector<36x128xbf16>, vector<256x128xf32> -> vector<256x128xf32>
    %cst_4 = arith.constant dense<0.000000e+00> : vector<128xf32>
    %25 = vector.multi_reduction <add>, %24, %cst_4 [0] : vector<256x128xf32> to vector<128xf32>
    %26 = vector.shape_cast %25 : vector<128xf32> to vector<1x128xf32>
    %c0_5 = arith.constant 0 : index
    %c0_6 = arith.constant 0 : index
    %c0_7 = arith.constant 0 : index
    %c0_8 = arith.constant 0 : index
    %27 = vector.load %arg5[%c0_5, %c0_6, %c0_7, %c0_8] : memref<1x1x2x128xf32, #tpu.memory_space<vmem>>, vector<1x1x1x128xf32>
    %28 = vector.shape_cast %27 : vector<1x1x1x128xf32> to vector<1x128xf32>
    %29 = vector.shape_cast %26 : vector<1x128xf32> to vector<1x1x1x128xf32>
    tpu.vector_store %arg5[%c0_5, %c0_6, %c0_7, %c0_8], %29 {strides = array<i32>} : memref<1x1x2x128xf32, #tpu.memory_space<vmem>>, vector<1x1x1x128xf32>,
    %30 = arith.mulf %24, %24 : vector<256x128xf32>
    %cst_9 = arith.constant dense<0.000000e+00> : vector<128xf32>
    %31 = vector.multi_reduction <add>, %30, %cst_9 [0] : vector<256x128xf32> to vector<128xf32>
    %32 = vector.shape_cast %31 : vector<128xf32> to vector<1x128xf32>
    %c0_10 = arith.constant 0 : index
    %c0_11 = arith.constant 0 : index
    %c1 = arith.constant 1 : index
    %c0_12 = arith.constant 0 : index
    %33 = vector.load %arg5[%c0_10, %c0_11, %c1, %c0_12] : memref<1x1x2x128xf32, #tpu.memory_space<vmem>>, vector<1x1x1x128xf32>
    %34 = vector.shape_cast %33 : vector<1x1x1x128xf32> to vector<1x128xf32>
    %35 = vector.shape_cast %32 : vector<1x128xf32> to vector<1x1x1x128xf32>
    tpu.vector_store %arg5[%c0_10, %c0_11, %c1, %c0_12], %35 {strides = array<i32>} : memref<1x1x2x128xf32, #tpu.memory_space<vmem>>, vector<1x1x1x128xf32>,
    %36 = tpu.transpose %24, [1, 0] : vector<256x128xf32> -> vector<128x256xf32>
    %37 = vector.extract_strided_slice %36 {offsets = [0, 0], sizes = [8, 256], strides = [1, 1]} : vector<128x256xf32> to vector<8x256xf32>
    %38 = arith.truncf %37 : vector<8x256xf32> to vector<8x256xbf16>
    %c0_13 = arith.constant 0 : index
    %c0_14 = arith.constant 0 : index
    %c0_15 = arith.constant 0 : index
    %39 = vector.load %arg4[%c0_13, %c0_14, %c0_15] : memref<1x8x256xbf16, #tpu.memory_space<vmem>>, vector<1x8x256xbf16>
    %40 = vector.shape_cast %39 : vector<1x8x256xbf16> to vector<8x256xbf16>
    %41 = vector.shape_cast %38 : vector<8x256xbf16> to vector<1x8x256xbf16>
    tpu.vector_store %arg4[%c0_13, %c0_14, %c0_15], %41 {strides = array<i32>} : memref<1x8x256xbf16, #tpu.memory_space<vmem>>, vector<1x8x256xbf16>,
    return
  }
  func.func @transform_0(%arg0: i32, %arg1: i32) -> (i32, i32, i32, i32) {
    %c0_i32 = arith.constant 0 : i32
    %c0_i32_0 = arith.constant 0 : i32
    %c0_i32_1 = arith.constant 0 : i32
    %c0_i32_2 = arith.constant 0 : i32
    return %arg0, %c0_i32, %c0_i32_0, %c0_i32_1 : i32, i32, i32, i32
  }
  func.func @transform_1(%arg0: i32, %arg1: i32) -> (i32, i32) {
    %c0_i32 = arith.constant 0 : i32
    %c0_i32_0 = arith.constant 0 : i32
    %c0_i32_1 = arith.constant 0 : i32
    return %c0_i32, %c0_i32_0 : i32, i32
  }
  func.func @transform_2(%arg0: i32, %arg1: i32) -> (i32, i32, i32) {
    %c0_i32 = arith.constant 0 : i32
    %c0_i32_0 = arith.constant 0 : i32
    return %arg0, %c0_i32, %arg1 : i32, i32, i32
  }
  func.func @transform_3(%arg0: i32, %arg1: i32) -> (i32, i32, i32, i32) {
    %c0_i32 = arith.constant 0 : i32
    %c0_i32_0 = arith.constant 0 : i32
    %c0_i32_1 = arith.constant 0 : i32
    return %arg0, %arg1, %c0_i32, %c0_i32_0 : i32, i32, i32, i32
  }
}

</mosaic_0001>

<bundles_post_ra>
// kernel: tpu_custom_call.1
= control target key start
LH: loop header
LB: loop body
LE: loop exit
PB: predicated region body
PF: predicated region fallthrough
CT: control target
= control target key end

     0   :  { %9 = vsyncpa [#allocation3], 0  ;;  %s3763_s0 = inlined_call_operand.vmem [shape: bf16[2,18,18,4], index: 0, kind: input, shape index: {}]   ;;  %s3764_s1 = inlined_call_operand.vmem [shape: bf16[36,128], index: 1, kind: input, shape index: {}]   ;;  %s3765_s2 = inlined_call_operand.hbm [shape: bf16[2,8,256], index: 2, kind: output, shape index: {0}]   ;;  %s3766_s3 = inlined_call_operand.hbm [shape: f32[2,1,2,128], index: 3, kind: output, shape index: {1}]  }
   0x1   :  { %11 = vsyncpa [#allocation3 + $0x1], 0 }
   0x2   :  { %12 = vsyncpa [#allocation5], 0 }
   0x3   :  { %14 = vsyncpa [#allocation5 + $0x1], 0  ;;  %s2555_s12 = smov 0   ;;  %s2557_s13 = smov 0  }
   0x4   :  { %s2559_s14 = smov 0   ;;  %s2561_s15 = smov 0  }
   0x5   :  { %s2563_s16 = smov 0   ;;  %s2565_s17 = smov 0  }
   0x6 LB: > { %s2112_s18 = sadd.s32 4294967295, %s2523_s17   ;;  %s2113_s19 = sadd.s32 4294967294, %s2523_s17   ;;  %s2523_s17 = sphi %s2565_s17, %s20_s17   ;;  %s2519_s16 = sphi %s2563_s16, %s3777_s16   ;;  %s2515_s15 = sphi %s2561_s15, %s3776_s15   ;;  %s2511_s14 = sphi %s2559_s14, %s3775_s14   ;;  %s2507_s13 = sphi %s2557_s13, %s3774_s13   ;;  %s2503_s12 = sphi %s2555_s12, %s3773_s12  }
   0x7   : > { %s32_s20 = sadd.s32 1, %s2519_s16  ;;  %s88_s21 = sadd.s32 1, %s2511_s14 }
   0x8   : > { %p34_p0 = scmp.ge.s32.totalorder %s32_s20, 2  ;;  %p98_p1 = scmp.ne.s32.totalorder %s2511_s14, %s2507_s13 }
   0x9   : > { %p99_p2 = scmp.eq.s32.totalorder %s2112_s18, 1  ;;  %p104_p3 = scmp.ne.s32.totalorder %s2507_s13, %s2503_s12 }
   0xa   : > { %s3779_s20 = smov (%p34_p0, %s32_s20), 0  ;;  %p105_p5 = scmp.eq.s32.totalorder %s2113_s19, 1 }
   0xb   : > { %p2595_p4 = por %p99_p2, %p98_p1  ;;  %s83_s23 = ssub.s32 %s2519_s16, %s3779_s20 }
   0xc   : > { %p2116_p6 = scmp.ge.s32.totalorder %s2523_s17, 1  ;;  %p86_p7 = scmp.eq.s32.totalorder %s83_s23, 0 }
   0xd   : > { %p2602_p8 = por %p105_p5, %p104_p3  ;;  %p162_p9 = scmp.lt.s32.totalorder %s2523_s17, 3 }
   0xe   : > { %s2608_s25 = scalar_select %p86_p7, %s2511_s14, %s88_s21  }
   0xf   : > { %p163_p10 = pnand %p2116_p6, %p162_p9 }
  0x10   : > { %p191_p11 = scmp.lt.s32.totalorder (!%p163_p10), %s2515_s15, 1  ;;  %vm691_vm0 = vcmask (!%p163_p10), 1042432   ;;  %vm692_vm1 = vcmask (!%p163_p10), 1046532   ;;  %vm256_vm2 = vsmask.f32 (!%p163_p10), 3328  ;;  %s2525_s4 = smov (!%p163_p10), 12  }
  0x11   : > { %166 = sbr.rel (%p163_p10) target bundleno = 722 (0x2d2), region = 28  ;;  %vm257_vm3 = vsmask.f32 (!%p163_p10), 7440  ;;  %vm2637_vm4 = vmor (!%p163_p10), %vm691_vm0, %vm692_vm1  ;;  %s2526_s5 = smov (!%p163_p10), 20   ;;  %vm1625_vm6 = vcmask (!%p163_p10), 1041408   ;;  %vm1292_vm7 = vcmask (!%p163_p10), 31744  }
  0x12   : > { %vm2672_vm5 = vmor (!%p163_p10), %vm256_vm2, %vm257_vm3  ;;  %s2527_s6 = smov (!%p163_p10), 8   ;;  %s2528_s7 = smov (!%p163_p10), 4   ;;  %vm1341_vm8 = vcmask (!%p163_p10), 64512   ;;  %vm1374_vm9 = vcmask (!%p163_p10), 97280   ;;  %vm1407_vm10 = vcmask (!%p163_p10), 130048   ;;  %vm1440_vm11 = vcmask (!%p163_p10), 162816  }
  0x13   : > { %s2529_s18 = smov (!%p163_p10), 16   ;;  %s2530_s19 = smov (!%p163_p10), 24   ;;  %vm1473_vm12 = vcmask (!%p163_p10), 195584   ;;  %vm1506_vm13 = vcmask (!%p163_p10), 228352   ;;  %vm1539_vm14 = vcmask (!%p163_p10), 261120   ;;  %vm1592_vm15 = vcmask (!%p163_p10), 293888  }
  0x14   : > { %s2531_s21 = smov (!%p163_p10), 28   ;;  %s2532_s23 = smov (!%p163_p10), 32  }
  0x15   : > { %s3677_s28 = sand.u32 (!%p163_p10), 1, %s2507_s13   ;;  %s2533_s11 = smov (!%p163_p10), [#allocation4]  }
  0x16   : > { %s2118_s29 = sshll.u32 (!%p163_p10), %s3677_s28, 1  ;;  %s1977_s9 = scalar_lea.sflag (!%p163_p10), [#allocation5], %s3677_s28 }
  0x18   : > { %s192_s26 = scalar_select %p191_p11, %s2515_s15, 1 }
  0x1a   : > { %s2286_s27 = smul.u32 216, %s192_s26 }
  0x1c   : > { %s2615_s30 = scalar_lea.vmem %s3763_s0, %s2286_s27 }
  0x1d   : > { %v2618_v0 = vld [vmem:[%s2615_s30 + $0x18] sm:$0xf]  ;;  %v2621_v1 = vld [vmem:[%s2615_s30 + $0x1c] sm:$0xf]  ;;  %v205_v2 = vld [vmem:[%s2615_s30 + $0xc] sm:$0xf] }
  0x1e   : > { %v321_v3 = vshrl.u32 %v2621_v1, 16  ;;  %v2627_v4 = vcombine.low %v2618_v0, %v2621_v1  ;;  %v308_v5 = vshrl.u32 %v2618_v0, 16  ;;  %v311_v6 = vshll.u32 %v2618_v0, 16  ;;  %v206_v7 = vld [vmem:[%s2615_s30 + $0x10] sm:$0xf] }
  0x1f   : > { %v293_v8 = vshll.u32 %v206_v7, 16  ;;  %v297_v9 = vshrl.u32 %v206_v7, 16  ;;  %v2632_v10 = vcombine.low %v205_v2, %v206_v7  ;;  %v284_v11 = vshrl.u32 %v205_v2, 16  ;;  %v207_v12 = vld [vmem:[%s2615_s30 + $0x14] sm:$0x1] }
  0x20   : > { %1087 = vrot.lane.b32.xlu1 %v2627_v4, %s2525_s4  ;;  %v287_v14 = vshll.u32 %v205_v2, 16  ;;  %v2121_v15 = vrot.slane %v205_v2, 9  ;;  %v703_v16 = vrot.slane %v206_v7, 5  ;;  %v706_v17 = vrot.slane %v207_v12, 5  ;;  %v2644_v18 = vld [vmem:[%s2615_s30] sm:$0xf] }
  0x21   : > { %v299_v19 = vrot.slane %v297_v9, 4  ;;  %1085 = vrot.lane.b32.xlu0 %v2632_v10, %s2525_s4  ;;  %v286_v20 = vrot.slane %v284_v11, 4  ;;  %v2649_v21 = vld [vmem:[%s2615_s30 + $0x4] sm:$0xf]  ;;  %v204_v22 = vld [vmem:[%s2615_s30 + $0x8] sm:$0x1] }
  0x22   : > { %v289_v23 = vrot.slane %v287_v14, 5  ;;  %v704_v24 = vsel %vm2637_vm4, %v2121_v15, %v703_v16  ;;  %v705_v25 = vrot.slane %v703_v16, 4  ;;  %v2120_v26 = vrot.slane %v2644_v18, 9  ;;  %v210_v35 = vld [vmem:[%s2615_s30 + $0x20] sm:$0x1] }
  0x23   : > { %v696_v27 = vrot.slane %v2649_v21, 5  ;;  %v699_v28 = vrot.slane %v204_v22, 5  ;;  %v260_v29 = vshrl.u32 %v2644_v18, 16  ;;  %v263_v30 = vshll.u32 %v2644_v18, 16  ;;  %v2686_v7 = vld [vmem:[%s2615_s30 + $0x24] sm:$0xf] }
  0x24   : > { %v707_v31 = vsel %vm2637_vm4, %v705_v25, %v706_v17  ;;  %v269_v32 = vshll.u32 %v2649_v21, 16  ;;  %v273_v33 = vshrl.u32 %v2649_v21, 16  ;;  %v279_v34 = vshll.u32 %v204_v22, 16 }
  0x25   : > { %v2171_v36 = vcombine.low %v704_v24, %v707_v31  ;;  %v697_v37 = vsel %vm2637_vm4, %v2120_v26, %v696_v27  ;;  %v698_v38 = vrot.slane %v696_v27, 4  ;;  %v262_v39 = vrot.slane %v260_v29, 4  ;;  %v213_v26 = vld [vmem:[%s2615_s30 + $0x2c] sm:$0x1] }
  0x26   : > { %v265_v40 = vrot.slane %v263_v30, 5  ;;  %v271_v41 = vrot.slane %v269_v32, 5  ;;  %v275_v42 = vrot.slane %v273_v33, 4  ;;  %v281_v43 = vrot.slane %v279_v34, 5 }
  0x27   : > { %1155 = vrot.lane.b32.xlu0 %v2171_v36, %s2526_s5  ;;  %v700_v44 = vsel %vm2637_vm4, %v698_v38, %v699_v28  ;;  %v2122_v45 = vrot.slane %v2618_v0, 9  ;;  %v710_v46 = vrot.slane %v2621_v1, 5  ;;  %v713_v47 = vrot.slane %v210_v35, 5  ;;  %v2720_v38 = vld [vmem:[%s2615_s30 + $0x60] sm:$0xf] }
  0x28   : > { %v2170_v48 = vcombine.low %v697_v37, %v700_v44  ;;  %v266_v49 = vor.u32 %v265_v40, %v262_v39  ;;  %v276_v50 = vor.u32 %v275_v42, %v271_v41  ;;  %v290_v51 = vor.u32 %v289_v23, %v286_v20  ;;  %v2405_v39 = vld [vmem:[%s3764_s1 + $0x8] sm:$0xff]   ;;  %v2726_v40 = vld [vmem:[%s2615_s30 + $0x64] sm:$0xf] }
  0x29   : > { %v711_v53 = vsel %vm2637_vm4, %v2122_v45, %v710_v46  ;;  %v712_v54 = vrot.slane %v710_v46, 4  ;;  %v295_v55 = vrot.slane %v293_v8, 5  ;;  %v303_v56 = vshll.u32 %v207_v12, 16  ;;  %v2697_v12 = vld [vmem:[%s2615_s30 + $0x28] sm:$0xf] }
  0x2a   : > { %1050 = vrot.lane.b32.xlu1 %v2170_v48, %s2527_s6  ;;  %v267_v57 = vrot.slane %v266_v49, 4  ;;  %v277_v58 = vrot.slane %v276_v50, 4  ;;  %v291_v59 = vrot.slane %v290_v51, 4  ;;  %v310_v60 = vrot.slane %v308_v5, 4 }
  0x2b   : > { %v714_v61 = vsel %vm2637_vm4, %v712_v54, %v713_v47  ;;  %v300_v62 = vor.u32 %v299_v19, %v295_v55  ;;  %v305_v63 = vrot.slane %v303_v56, 5  ;;  %v313_v2 = vrot.slane %v311_v6, 5 }
  0x2c   : > { %v272_v8 = vsel %vm2672_vm5, %v267_v57, %v271_v41  ;;  %v282_v9 = vsel %vm2672_vm5, %v277_v58, %v281_v43  ;;  %v2692_v11 = vcombine.low %v711_v53, %v714_v61  ;;  %v296_v5 = vsel %vm2672_vm5, %v291_v59, %v295_v55 }
  0x2d   : > { %v2154_v14 = vcombine.low %v272_v8, %v282_v9  ;;  %v301_v15 = vrot.slane %v300_v62, 4  ;;  %v314_v0 = vor.u32 %v313_v2, %v310_v60  ;;  %v317_v6 = vshll.u32 %v2621_v1, 16  ;;  %v2404_v1 = vld [vmem:[%s3764_s1] sm:$0xff]   ;;  %v2753_v2 = vld [vmem:[%s2615_s30 + $0x68] sm:$0x1] }
  0x2e   : > { %1052 = vrot.lane.b32.xlu1 %v2171_v36, %s2527_s6  ;;  %v323_v16 = vrot.slane %v321_v3, 4  ;;  %v327_v17 = vshll.u32 %v210_v35, 16  ;;  %v332_v19 = vshrl.u32 %v2686_v7, 16  ;;  %v335_v20 = vshll.u32 %v2686_v7, 16  ;;  %2240 = vmatprep.subr.bf16.mxu0 %v2404_v1  ;;  %v2759_v8 = vld [vmem:[%s2615_s30 + $0x70] sm:$0xf] }
  0x2f   : > { %970 = vrot.lane.b32.xlu0 %v2154_v14, %s2528_s7  ;;  %v306_v22 = vsel %vm2672_vm5, %v301_v15, %v305_v63  ;;  %v315_v23 = vrot.slane %v314_v0, 4  ;;  %v319_v24 = vrot.slane %v317_v6, 5  ;;  %v345_v25 = vshrl.u32 %v2697_v12, 16  ;;  %2278 = vmatprep.subr.bf16.mxu1 %v2404_v1  ;;  %v2768_v0 = vld [vmem:[%s2615_s30 + $0x30] sm:$0xf] }
  0x30   : > { %v2155_v3 = vcombine.low %v296_v5, %v306_v22  ;;  %v334_v27 = vrot.slane %v332_v19, 4  ;;  %v329_v29 = vrot.slane %v327_v17, 5  ;;  %v337_v30 = vrot.slane %v335_v20, 5  ;;  %2241 = vmatpush3.bf16.msra.mxu0 %v2404_v1  ;;  %2281 = vmatpush3.bf16.msra.mxu1 %v2404_v1  ;;  %v2777_v20 = vld [vmem:[%s2615_s30 + $0x34] sm:$0xf] }
  0x31   : > { %v324_v28 = vor.u32 %v323_v16, %v319_v24  ;;  %v341_v31 = vshll.u32 %v2697_v12, 16  ;;  %v347_v32 = vrot.slane %v345_v25, 4  ;;  %v351_v33 = vshll.u32 %v213_v26, 16  ;;  %2242 = vmatprep.subr.bf16.mxu0 %v2405_v39  ;;  %2279 = vmatprep.subr.bf16.mxu1 %v2405_v39 }
  0x32   : > { %1157 = vrot.lane.b32.xlu1 %v2692_v11, %s2526_s5  ;;  %v320_v34 = vsel %vm2672_vm5, %v315_v23, %v319_v24  ;;  %v338_v36 = vor.u32 %v337_v30, %v334_v27  ;;  %v717_v46 = vrot.slane %v2697_v12, 5  ;;  %v452_v47 = vshrl.u32 %v2720_v38, 16 }
  0x33   : > { %972 = vrot.lane.b32.xlu0 %v2155_v3, %s2528_s7  ;;  %v325_v35 = vrot.slane %v324_v28, 4  ;;  %v343_v37 = vrot.slane %v341_v31, 5  ;;  %v353_v44 = vrot.slane %v351_v33, 5  ;;  %v455_v48 = vshll.u32 %v2720_v38, 16 }
  0x34   : > { %v339_v42 = vrot.slane %v338_v36, 4  ;;  %2243 = vmatpush3.bf16.msra.mxu0 %v2405_v39  ;;  %v461_v50 = vshll.u32 %v2726_v40, 16  ;;  %2282 = vmatpush3.bf16.msra.mxu1 %v2405_v39  ;;  %v2738_v51 = vcombine.low %v2686_v7, %v2697_v12  ;;  %v465_v53 = vshrl.u32 %v2726_v40, 16 }
  0x35   : > { %v330_v41 = vsel %vm2672_vm5, %v325_v35, %v329_v29  ;;  %v348_v43 = vor.u32 %v347_v32, %v343_v37  ;;  %v2123_v56 = vrot.slane %v2686_v7, 9  ;;  %v719_v57 = vrot.slane %v717_v46, 4  ;;  %v2756_v7 = vld [vmem:[%s2615_s30 + $0x6c] sm:$0xf]  ;;  %v231_v29 = vld [vmem:[%s2615_s30 + $0x74] sm:$0x1] }
  0x36   : > { %v2156_v45 = vcombine.low %v320_v34, %v330_v41  ;;  %v344_v54 = vsel %vm2672_vm5, %v339_v42, %v343_v37  ;;  %v720_v58 = vrot.slane %v213_v26, 5  ;;  %v454_v59 = vrot.slane %v452_v47, 4 }
  0x37   : > { %1120 = vrot.lane.b32.xlu0 %v2155_v3, %s2529_s18  ;;  %v349_v49 = vrot.slane %v348_v43, 4  ;;  %v457_v60 = vrot.slane %v455_v48, 5  ;;  %v463_v61 = vrot.slane %v461_v50, 5  ;;  %v467_v62 = vrot.slane %v465_v53, 4 }
  0x38   : > { %1122 = vrot.lane.b32.xlu1 %v2156_v45, %s2529_s18  ;;  %v718_v9 = vsel %vm2637_vm4, %v2123_v56, %v717_v46  ;;  %v721_v5 = vsel %vm2637_vm4, %v719_v57, %v720_v58  ;;  %v471_v15 = vshll.u32 %v2753_v2, 16  ;;  %v476_v6 = vshrl.u32 %v2756_v7, 16 }
  0x39   : > { %v354_v55 = vsel %vm2672_vm5, %v349_v49, %v353_v44  ;;  %v458_v12 = vor.u32 %v457_v60, %v454_v59  ;;  %v468_v14 = vor.u32 %v467_v62, %v463_v61  ;;  %v479_v16 = vshll.u32 %v2756_v7, 16 }
  0x3a   : > { %v2750_v63 = vcombine.low %v344_v54, %v354_v55  ;;  %v485_v17 = vshll.u32 %v2759_v8, 16  ;;  %v489_v19 = vshrl.u32 %v2759_v8, 16  ;;  %v2779_v22 = vcombine.low %v718_v9, %v721_v5 }
  0x3b   : > { %1190 = vrot.lane.b32.xlu0 %v2627_v4, %s2530_s19  ;;  %v459_v23 = vrot.slane %v458_v12, 4  ;;  %v356_v24 = vshrl.u32 %v2768_v0, 16  ;;  %v359_v25 = vshll.u32 %v2768_v0, 16  ;;  %v469_v26 = vrot.slane %v468_v14, 4 }
  0x3c   : > { %1192 = vrot.lane.b32.xlu1 %v2738_v51, %s2530_s19  ;;  %v473_v1 = vrot.slane %v471_v15, 5  ;;  %v478_v3 = vrot.slane %v476_v6, 4  ;;  %v481_v27 = vrot.slane %v479_v16, 5  ;;  %v369_v28 = vshrl.u32 %v2777_v20, 16 }
  0x3d   : > { %v487_v30 = vrot.slane %v485_v17, 5  ;;  %v491_v31 = vrot.slane %v489_v19, 4  ;;  %v365_v32 = vshll.u32 %v2777_v20, 16  ;;  %v464_v33 = vsel %vm2672_vm5, %v459_v23, %v463_v61 }
  0x3e   : > { %v474_v34 = vsel %vm2672_vm5, %v469_v26, %v473_v1  ;;  %v482_v35 = vor.u32 %v481_v27, %v478_v3  ;;  %v495_v36 = vshll.u32 %v231_v29, 16  ;;  %v358_v37 = vrot.slane %v356_v24, 4  ;;  %v2839_v24 = vld [vmem:[%s2615_s30 + $0x78] sm:$0xf] }
  0x3f   : > { %1225 = vrot.lane.b32.xlu0 %v2156_v45, %s2531_s21  ;;  %v492_v39 = vor.u32 %v491_v31, %v487_v30  ;;  %v361_v41 = vrot.slane %v359_v25, 5  ;;  %v367_v42 = vrot.slane %v365_v32, 5  ;;  %v371_v43 = vrot.slane %v369_v28, 4  ;;  %v2842_v25 = vld [vmem:[%s2615_s30 + $0x7c] sm:$0xf] }
  0x40   : > { %1227 = vrot.lane.b32.xlu1 %v2750_v63, %s2531_s21  ;;  %v752_v44 = vrot.slane %v2726_v40, 5  ;;  %v2801_v46 = vcombine.low %v464_v33, %v474_v34  ;;  %v483_v47 = vrot.slane %v482_v35, 4  ;;  %v497_v48 = vrot.slane %v495_v36, 5  ;;  %v2856_v28 = vld [vmem:[%s2615_s30 + $0x3c] sm:$0xf] }
  0x41   : > { %v493_v49 = vrot.slane %v492_v39, 4  ;;  %v362_v50 = vor.u32 %v361_v41, %v358_v37  ;;  %v372_v53 = vor.u32 %v371_v43, %v367_v42  ;;  %v2128_v55 = vrot.slane %v2720_v38, 9  ;;  %v2862_v31 = vld [vmem:[%s2615_s30 + $0x40] sm:$0xf] }
  0x42   : > { %v754_v56 = vrot.slane %v752_v44, 4  ;;  %v755_v57 = vrot.slane %v2753_v2, 5  ;;  %v488_v58 = vsel %vm2672_vm5, %v483_v47, %v487_v30  ;;  %v759_v59 = vrot.slane %v2759_v8, 5 }
  0x43   : > { %1260 = vrot.lane.b32.xlu0 %v2692_v11, %s2532_s23  ;;  %v498_v60 = vsel %vm2672_vm5, %v493_v49, %v497_v48  ;;  %v363_v61 = vrot.slane %v362_v50, 4  ;;  %v373_v62 = vrot.slane %v372_v53, 4  ;;  %v753_v9 = vsel %vm2637_vm4, %v2128_v55, %v752_v44 }
  0x44   : > { %974 = vrot.lane.b32.xlu1 %v2156_v45, %s2528_s7  ;;  %v216_v45 = vld [vmem:[%s2615_s30 + $0x38] sm:$0x1]  ;;  %v756_v5 = vsel %vm2637_vm4, %v754_v56, %v755_v57  ;;  %v2129_v12 = vrot.slane %v2756_v7, 9  ;;  %v2827_v14 = vcombine.low %v488_v58, %v498_v60  ;;  %v761_v15 = vrot.slane %v759_v59, 4 }
  0x45   : > { %v375_v54 = vshll.u32 %v216_v45, 16  ;;  %v762_v6 = vrot.slane %v231_v29, 5  ;;  %v2831_v16 = vcombine.low %v753_v9, %v756_v5  ;;  %v368_v17 = vsel %vm2672_vm5, %v363_v61, %v367_v42 }
  0x46   : > { %v724_v23 = vrot.slane %v2777_v20, 5  ;;  %v760_v26 = vsel %vm2637_vm4, %v2129_v12, %v759_v59  ;;  %v500_v27 = vshrl.u32 %v2839_v24, 16  ;;  %v513_v30 = vshrl.u32 %v2842_v25, 16 }
  0x47   : > { %1262 = vrot.lane.b32.xlu0 %v2779_v22, %s2532_s23  ;;  %v377_v2 = vrot.slane %v375_v54, 5  ;;  %v763_v3 = vsel %vm2637_vm4, %v761_v15, %v762_v6  ;;  %v509_v32 = vshll.u32 %v2842_v25, 16  ;;  %v2867_v33 = vcombine.low %v2756_v7, %v2759_v8  ;;  %v234_v8 = vld [vmem:[%s2615_s30 + $0x80] sm:$0x1]  ;;  %v219_v54 = vld [vmem:[%s2615_s30 + $0x44] sm:$0x1] }
  0x48   : > { %976 = vrot.lane.b32.xlu1 %v2750_v63, %s2528_s7  ;;  %v726_v29 = vrot.slane %v724_v23, 4  ;;  %v2869_v34 = vcombine.low %v760_v26, %v763_v3  ;;  %v380_v36 = vshrl.u32 %v2856_v28, 16  ;;  %v383_v37 = vshll.u32 %v2856_v28, 16  ;;  %v2406_v6 = vld [vmem:[%s3764_s1 + $0x10] ss:$0 sps:$4 sm:$0x33]  }
  0x49   : > { %v378_v19 = vsel %vm2672_vm5, %v373_v62, %v377_v2  ;;  %v393_v39 = vshrl.u32 %v2862_v31, 16  ;;  %v502_v41 = vrot.slane %v500_v27, 4  ;;  %v511_v43 = vrot.slane %v509_v32, 5  ;;  %2284 = vmatprep.subr.msk.bf16.mxu0 %vm1625_vm6, %v2406_v6  ;;  %2285 = vmatprep.subr.msk.bf16.mxu1 %vm1625_vm6, %v2406_v6 }
  0x4a   : > { %v2849_v1 = vcombine.low %v368_v17, %v378_v19  ;;  %v515_v44 = vrot.slane %v513_v30, 4  ;;  %v2138_v47 = vcombine.low %v2644_v18, %v2649_v21  ;;  %v519_v50 = vshll.u32 %v234_v8, 16 }
  0x4b   : > { %1054 = vrot.lane.b32.xlu0 %v2692_v11, %s2527_s6  ;;  %v2811_v11 = vcombine.low %v2768_v0, %v2777_v20  ;;  %v503_v20 = vshll.u32 %v2839_v24, 16  ;;  %v382_v53 = vrot.slane %v380_v36, 4  ;;  %v385_v55 = vrot.slane %v383_v37, 5 }
  0x4c   : > { %1056 = vrot.lane.b32.xlu1 %v2779_v22, %s2527_s6  ;;  %v395_v57 = vrot.slane %v393_v39, 4  ;;  %v2897_v58 = vcombine.low %v2839_v24, %v2842_v25  ;;  %v521_v59 = vrot.slane %v519_v50, 5  ;;  %v399_v60 = vshll.u32 %v219_v54, 16  ;;  %v235_v39 = vld [vmem:[%s2615_s30 + $0x84] sm:$0xf] }
  0x4d   : > { %v505_v42 = vrot.slane %v503_v20, 5  ;;  %v386_v2 = vor.u32 %v385_v55, %v382_v53  ;;  %v2905_v5 = vcombine.low %v2856_v28, %v2862_v31  ;;  %v766_v15 = vrot.slane %v2842_v25, 5 }
  0x4e   : > { %v401_v12 = vrot.slane %v399_v60, 5  ;;  %v769_v3 = vrot.slane %v234_v8, 5  ;;  %v1627_v30 = vsel %vm1625_vm6, %v2406_v6, 0  ;;  %v2125_v32 = vrot.slane %v2856_v28, 9 }
  0x4f   : > { %1089 = vrot.lane.b32.xlu0 %v2738_v51, %s2525_s4  ;;  %v506_v49 = vor.u32 %v505_v42, %v502_v41  ;;  %2245 = vmatpush3.bf16.msra.mxu0 %v1627_v30  ;;  %v734_v37 = vrot.slane %v219_v54, 5  ;;  %v236_v41 = vld [vmem:[%s2615_s30 + $0x88] sm:$0xf]  ;;  %v2944_v42 = vcombine.low %v2720_v38, %v2726_v40  ;;  %v524_v8 = vshrl.u32 %v235_v39, 16  ;;  %v237_v54 = vld [vmem:[%s2615_s30 + $0x8c] sm:$0x1] }
  0x50   : > { %986 = vrot.lane.b32.xlu1 %v2801_v46, %s2528_s7  ;;  %2283 = vmatpush3.bf16.msra.mxu1 %v1627_v30  ;;  %v533_v38 = vshll.u32 %v236_v41, 16  ;;  %v222_v30 = vld [vmem:[%s2615_s30 + $0x50] sm:$0x1] }
  0x51   : > { %v507_v61 = vrot.slane %v506_v49, 4  ;;  %v526_v49 = vrot.slane %v524_v8, 4 }
  0x52   : > { %v535_v53 = vrot.slane %v533_v38, 5  ;;  %v3015_v38 = vld [vmem:[%s2615_s30 + $0x90] sm:$0xf] }
  0x53   : > { %1091 = vrot.lane.b32.xlu0 %v2811_v11, %s2525_s4  ;;  %v512_v17 = vsel %vm2672_vm5, %v507_v61, %v511_v43 }
  0x54   : > { %1124 = vrot.lane.b32.xlu1 %v2750_v63, %s2529_s18  ;;  %v2124_v63 = vrot.slane %v2768_v0, 9  ;;  %v727_v0 = vrot.slane %v216_v45, 5  ;;  %v389_v45 = vshll.u32 %v2862_v31, 16 }
  0x56   : > { %v725_v35 = vsel %vm2637_vm4, %v2124_v63, %v724_v23  ;;  %v728_v7 = vsel %vm2637_vm4, %v726_v29, %v727_v0  ;;  %v391_v56 = vrot.slane %v389_v45, 5  ;;  %v387_v23 = vrot.slane %v386_v2, 4  ;;  %v221_v2 = vld [vmem:[%s2615_s30 + $0x4c] sm:$0xf] }
  0x57   : > { %988 = vrot.lane.b32.xlu0 %v2827_v14, %s2528_s7  ;;  %v2888_v48 = vcombine.low %v725_v35, %v728_v7  ;;  %v2130_v63 = vrot.slane %v2839_v24, 9  ;;  %v768_v29 = vrot.slane %v766_v15, 4  ;;  %v731_v0 = vrot.slane %v2862_v31, 5 }
  0x58   : > { %1066 = vrot.lane.b32.xlu1 %v2831_v16, %s2527_s6  ;;  %v396_v9 = vor.u32 %v395_v57, %v391_v56  ;;  %v392_v27 = vsel %vm2672_vm5, %v387_v23, %v391_v56  ;;  %v537_v45 = vshrl.u32 %v236_v41, 16  ;;  %v543_v56 = vshll.u32 %v237_v54, 16 }
  0x59   : > { %v767_v35 = vsel %vm2637_vm4, %v2130_v63, %v766_v15  ;;  %v770_v36 = vsel %vm2637_vm4, %v768_v29, %v769_v3  ;;  %v733_v31 = vrot.slane %v731_v0, 4  ;;  %v732_v7 = vsel %vm2637_vm4, %v2125_v32, %v731_v0 }
  0x5a   : > { %v397_v26 = vrot.slane %v396_v9, 4  ;;  %v2948_v28 = vcombine.low %v767_v35, %v770_v36  ;;  %v2969_v57 = vcombine.low %v235_v39, %v236_v41  ;;  %v545_v61 = vrot.slane %v543_v56, 5 }
  0x5b   : > { %1126 = vrot.lane.b32.xlu0 %v2849_v1, %s2529_s18  ;;  %v417_v6 = vshrl.u32 %v221_v2, 16  ;;  %v776_v0 = vrot.slane %v237_v54, 5  ;;  %v548_v54 = vshrl.u32 %v3015_v38, 16 }
  0x5c   : > { %1159 = vrot.lane.b32.xlu1 %v2779_v22, %s2526_s5  ;;  %v516_v22 = vor.u32 %v515_v44, %v511_v43  ;;  %v402_v20 = vsel %vm2672_vm5, %v397_v26, %v401_v12  ;;  %v735_v43 = vsel %vm2637_vm4, %v733_v31, %v734_v37  ;;  %v527_v44 = vshll.u32 %v235_v39, 16 }
  0x5d   : > { %v2931_v24 = vcombine.low %v392_v27, %v402_v20  ;;  %v2958_v40 = vcombine.low %v732_v7, %v735_v43  ;;  %v419_v27 = vrot.slane %v417_v6, 4  ;;  %v2131_v20 = vrot.slane %v235_v39, 9 }
  0x5e   : > { %v517_v62 = vrot.slane %v516_v22, 4  ;;  %v529_v50 = vrot.slane %v527_v44, 5  ;;  %v539_v22 = vrot.slane %v537_v45, 4  ;;  %v423_v31 = vshll.u32 %v222_v30, 16 }
  0x5f   : > { %1068 = vrot.lane.b32.xlu0 %v2869_v34, %s2527_s6  ;;  %v738_v45 = vrot.slane %v221_v2, 5 }
  0x60   : > { %1101 = vrot.lane.b32.xlu1 %v2867_v33, %s2525_s4  ;;  %v522_v19 = vsel %vm2672_vm5, %v517_v62, %v521_v59  ;;  %v530_v55 = vor.u32 %v529_v50, %v526_v49  ;;  %v220_v62 = vld [vmem:[%s2615_s30 + $0x48] sm:$0xf]  ;;  %v425_v43 = vrot.slane %v423_v31, 5  ;;  %v3020_v50 = vld [vmem:[%s2615_s30 + $0x94] sm:$0xf] }
  0x61   : > { %v2919_v25 = vcombine.low %v512_v17, %v522_v19  ;;  %v404_v9 = vshrl.u32 %v220_v62, 16  ;;  %v407_v12 = vshll.u32 %v220_v62, 16  ;;  %v413_v17 = vshll.u32 %v221_v2, 16 }
  0x62   : > { %v531_v59 = vrot.slane %v530_v55, 4  ;;  %v773_v19 = vrot.slane %v236_v41, 5  ;;  %v2994_v32 = vcombine.low %v220_v62, %v221_v2  ;;  %v551_v55 = vshll.u32 %v3015_v38, 16 }
  0x63   : > { %1161 = vrot.lane.b32.xlu0 %v2888_v48, %s2526_s5  ;;  %v406_v26 = vrot.slane %v404_v9, 4  ;;  %v409_v63 = vrot.slane %v407_v12, 5  ;;  %v415_v3 = vrot.slane %v413_v17, 5  ;;  %v740_v56 = vrot.slane %v738_v45, 4 }
  0x64   : > { %1194 = vrot.lane.b32.xlu1 %v2811_v11, %s2530_s19  ;;  %v536_v15 = vsel %vm2672_vm5, %v531_v59, %v535_v53  ;;  %v775_v29 = vrot.slane %v773_v19, 4  ;;  %v774_v37 = vsel %vm2637_vm4, %v2131_v20, %v773_v19  ;;  %v741_v59 = vrot.slane %v222_v30, 5 }
  0x65   : > { %v410_v35 = vor.u32 %v409_v63, %v406_v26  ;;  %v420_v36 = vor.u32 %v419_v27, %v415_v3  ;;  %v553_v6 = vrot.slane %v551_v55, 5  ;;  %v3054_v26 = vld [vmem:[%s2615_s30 + $0x98] sm:$0x1] }
  0x66   : > { %v777_v39 = vsel %vm2637_vm4, %v775_v29, %v776_v0  ;;  %v742_v19 = vsel %vm2637_vm4, %v740_v56, %v741_v59  ;;  %v567_v0 = vshll.u32 %v3054_v26, 16 }
  0x67   : > { %1103 = vrot.lane.b32.xlu0 %v2897_v58, %s2525_s4  ;;  %v3004_v41 = vcombine.low %v774_v37, %v777_v39  ;;  %v411_v7 = vrot.slane %v410_v35, 4  ;;  %v421_v8 = vrot.slane %v420_v36, 4  ;;  %v3065_v36 = vld [vmem:[%s2615_s30 + $0x5c] sm:$0x1] }
  0x68   : > { %1136 = vrot.lane.b32.xlu1 %v2827_v14, %s2529_s18 }
  0x69   : > { %v416_v44 = vsel %vm2672_vm5, %v411_v7, %v415_v3 }
  0x6b   : > { %1196 = vrot.lane.b32.xlu0 %v2905_v5, %s2530_s19 }
  0x6c   : > { %1229 = vrot.lane.b32.xlu1 %v2849_v1, %s2531_s21 }
  0x6f   : > { %1138 = vrot.lane.b32.xlu0 %v2919_v25, %s2529_s18 }
  0x70   : > { %1171 = vrot.lane.b32.xlu1 %v2869_v34, %s2526_s5 }
  0x73   : > { %1231 = vrot.lane.b32.xlu0 %v2931_v24, %s2531_s21 }
  0x74   : > { %1264 = vrot.lane.b32.xlu1 %v2888_v48, %s2532_s23 }
  0x77   : > { %978 = vrot.lane.b32.xlu0 %v2849_v1, %s2528_s7  ;;  %v540_v1 = vor.u32 %v539_v22, %v535_v53 }
  0x78   : > { %1173 = vrot.lane.b32.xlu1 %v2948_v28, %s2526_s5 }
  0x79   : > { %v541_v60 = vrot.slane %v540_v1, 4  ;;  %v3031_v1 = vld [vmem:[%s2615_s30 + $0x54] sm:$0xf] }
  0x7a   : > { %v428_v9 = vshrl.u32 %v3031_v1, 16 }
  0x7b   : > { %1206 = vrot.lane.b32.xlu0 %v2897_v58, %s2530_s19 }
  0x7c   : > { %1266 = vrot.lane.b32.xlu1 %v2958_v40, %s2532_s23  ;;  %v430_v30 = vrot.slane %v428_v9, 4 }
  0x7f   : > { %980 = vrot.lane.b32.xlu0 %v2931_v24, %s2528_s7 }
  0x80   : > { %1058 = vrot.lane.b32.xlu1 %v2888_v48, %s2527_s6  ;;  %v546_v48 = vsel %vm2672_vm5, %v541_v60, %v545_v61  ;;  %v561_v60 = vshrl.u32 %v3020_v50, 16  ;;  %v3037_v61 = vld [vmem:[%s2615_s30 + $0x58] sm:$0xf] }
  0x81   : > { %v2985_v23 = vcombine.low %v536_v15, %v546_v48  ;;  %v441_v15 = vshrl.u32 %v3037_v61, 16  ;;  %v550_v48 = vrot.slane %v548_v54, 4  ;;  %v437_v27 = vshll.u32 %v3037_v61, 16 }
  0x82   : > { %v563_v3 = vrot.slane %v561_v60, 4  ;;  %v3082_v59 = vcombine.low %v3031_v1, %v3037_v61 }
  0x83   : > { %1208 = vrot.lane.b32.xlu0 %v2969_v57, %s2530_s19  ;;  %v554_v29 = vor.u32 %v553_v6, %v550_v48  ;;  %v439_v37 = vrot.slane %v437_v27, 5  ;;  %v443_v39 = vrot.slane %v441_v15, 4  ;;  %v783_v27 = vrot.slane %v3054_v26, 5 }
  0x84   : > { %1241 = vrot.lane.b32.xlu1 %v2919_v25, %s2531_s21 }
  0x85   : > { %v444_v55 = vor.u32 %v443_v39, %v439_v37 }
  0x87   : > { %1060 = vrot.lane.b32.xlu0 %v2958_v40, %s2527_s6  ;;  %v445_v15 = vrot.slane %v444_v55, 4 }
  0x88   : > { %1093 = vrot.lane.b32.xlu1 %v2905_v5, %s2525_s4 }
  0x8b   : > { %1243 = vrot.lane.b32.xlu0 %v2985_v23, %s2531_s21 }
  0x8c   : > { %1276 = vrot.lane.b32.xlu1 %v2948_v28, %s2532_s23 }
  0x8f   : > { %990 = vrot.lane.b32.xlu0 %v2919_v25, %s2528_s7  ;;  %v426_v25 = vsel %vm2672_vm5, %v421_v8, %v425_v43  ;;  %v3071_v8 = vcombine.low %v3015_v38, %v3020_v50  ;;  %v569_v43 = vrot.slane %v567_v0, 5  ;;  %v2127_v0 = vrot.slane %v3031_v1, 9 }
  0x90   : > { %1095 = vrot.lane.b32.xlu1 %v2994_v32, %s2525_s4  ;;  %v3026_v22 = vcombine.low %v416_v44, %v426_v25  ;;  %v447_v44 = vshll.u32 %v3065_v36, 16 }
  0x92   : > { %v3022_v53 = vpop.permute.xlu1 %1087  ;;  %v449_v60 = vrot.slane %v447_v44, 5 }
  0x93   : > { %1128 = vrot.lane.b32.xlu0 %v2931_v24, %s2529_s18  ;;  %v3017_v49 = vpop.permute.xlu0 %1085  ;;  %v2126_v24 = vrot.slane %v220_v62, 9  ;;  %v557_v62 = vshll.u32 %v3020_v50, 16 }
  0x94   : > { %1278 = vrot.lane.b32.xlu1 %v3004_v41, %s2532_s23 }
  0x95   : > { %v739_v2 = vsel %vm2637_vm4, %v2126_v24, %v738_v45  ;;  %v559_v63 = vrot.slane %v557_v62, 5  ;;  %v555_v45 = vrot.slane %v554_v29, 4  ;;  %v780_v62 = vrot.slane %v3020_v50, 5 }
  0x96   : > { %v3059_v20 = vcombine.low %v739_v2, %v742_v19  ;;  %v2132_v19 = vrot.slane %v3015_v38, 9 }
  0x97   : > { %992 = vrot.lane.b32.xlu0 %v2985_v23, %s2528_s7  ;;  %v564_v35 = vor.u32 %v563_v3, %v559_v63  ;;  %v560_v2 = vsel %vm2672_vm5, %v555_v45, %v559_v63  ;;  %v782_v3 = vrot.slane %v780_v62, 4 }
  0x98   : > { %1070 = vrot.lane.b32.xlu1 %v2948_v28, %s2527_s6  ;;  %v431_v28 = vshll.u32 %v3031_v1, 16  ;;  %v748_v1 = vrot.slane %v3065_v36, 5 }
  0x99   : > { %v3045_v12 = vpop.permute.xlu0 %1155  ;;  %v565_v24 = vrot.slane %v564_v35, 4  ;;  %v781_v35 = vsel %vm2637_vm4, %v2132_v19, %v780_v62 }
  0x9a   : > { %v433_v31 = vrot.slane %v431_v28, 5 }
  0x9b   : > { %1130 = vrot.lane.b32.xlu0 %v3026_v22, %s2529_s18  ;;  %v570_v9 = vsel %vm2672_vm5, %v565_v24, %v569_v43 }
  0x9c   : > { %1163 = vrot.lane.b32.xlu1 %v2958_v40, %s2526_s5  ;;  %v1051_v17 = vpop.permute.xlu1 %1050  ;;  %v434_v54 = vor.u32 %v433_v31, %v430_v30  ;;  %v3100_v63 = vcombine.low %v560_v2, %v570_v9  ;;  %v3124_v31 = vld [vmem:[%s2615_s30 + $0x9c] sm:$0xf] }
  0x9d   : > { %v572_v36 = vshrl.u32 %v3124_v31, 16 }
  0x9e   : > { %v435_v28 = vrot.slane %v434_v54, 4 }
  0x9f   : > { %1072 = vrot.lane.b32.xlu0 %v3004_v41, %s2527_s6 }
  0xa0   : > { %1105 = vrot.lane.b32.xlu1 %v2969_v57, %s2525_s4  ;;  %v1053_v40 = vpop.permute.xlu1 %1052  ;;  %v440_v21 = vsel %vm2672_vm5, %v435_v28, %v439_v37  ;;  %v3131_v37 = vld [vmem:[%s2615_s30 + $0xa0] sm:$0xf] }
  0xa1   : > { %v971_v7 = vpop.permute.xlu0 %970  ;;  %v585_v24 = vshrl.u32 %v3131_v37, 16 }
  0xa2   : > { %v1295_v48 = vsel %vm1292_vm7, %v2138_v47, %v971_v7  ;;  %v745_v47 = vrot.slane %v3037_v61, 5  ;;  %v784_v61 = vsel %vm2637_vm4, %v782_v3, %v783_v27 }
  0xa3   : > { %1165 = vrot.lane.b32.xlu0 %v3059_v20, %s2526_s5  ;;  %v1343_v18 = vsel %vm1341_vm8, %v1295_v48, %v1051_v17  ;;  %v3135_v44 = vcombine.low %v781_v35, %v784_v61  ;;  %v574_v48 = vrot.slane %v572_v36, 4 }
  0xa4   : > { %1198 = vrot.lane.b32.xlu1 %v2994_v32, %s2530_s19  ;;  %v3076_v25 = vpop.permute.xlu1 %1157  ;;  %v1376_v17 = vsel %vm1374_vm9, %v1343_v18, %v3017_v49  ;;  %v747_v49 = vrot.slane %v745_v47, 4  ;;  %v746_v45 = vsel %vm2637_vm4, %v2127_v0, %v745_v47 }
  0xa5   : > { %v973_v56 = vpop.permute.xlu0 %972 }
  0xa7   : > { %1107 = vrot.lane.b32.xlu0 %v3071_v8, %s2525_s4 }
  0xa8   : > { %1140 = vrot.lane.b32.xlu1 %v2985_v23, %s2529_s18  ;;  %v1298_v23 = vsel %vm1292_vm7, %v2632_v10, %v973_v56  ;;  %v450_v10 = vsel %vm2672_vm5, %v445_v15, %v449_v60  ;;  %v749_v56 = vsel %vm2637_vm4, %v747_v49, %v748_v1 }
  0xa9   : > { %v1121_v6 = vpop.permute.xlu0 %1120  ;;  %v1345_v29 = vsel %vm1341_vm8, %v1298_v23, %v1053_v40  ;;  %v3117_v30 = vcombine.low %v440_v21, %v450_v10  ;;  %v3162_v15 = vcombine.low %v746_v45, %v749_v56  ;;  %v587_v23 = vrot.slane %v585_v24, 4 }
  0xaa   : > { %v1123_v50 = vpop.permute.xlu1 %1122  ;;  %v1409_v40 = vsel %vm1407_vm10, %v1376_v17, %v1121_v6  ;;  %v1378_v39 = vsel %vm1374_vm9, %v1345_v29, %v3022_v53  ;;  %v575_v53 = vshll.u32 %v3124_v31, 16 }
  0xab   : > { %1200 = vrot.lane.b32.xlu0 %v3082_v59, %s2530_s19  ;;  %v1411_v54 = vsel %vm1407_vm10, %v1378_v39, %v1123_v50 }
  0xac   : > { %1233 = vrot.lane.b32.xlu1 %v3026_v22, %s2531_s21  ;;  %v1444_v28 = vsel %vm1440_vm11, %v1411_v54, %v3076_v25  ;;  %v577_v50 = vrot.slane %v575_v53, 5  ;;  %v243_v25 = vld [vmem:[%s2615_s30 + $0xa4] sm:$0x1] }
  0xad   : > { %v1191_v38 = vpop.permute.xlu0 %1190  ;;  %v591_v47 = vshll.u32 %v243_v25, 16  ;;  %v790_v53 = vrot.slane %v243_v25, 5 }
  0xae   : > { %v1193_v26 = vpop.permute.xlu1 %1192  ;;  %v578_v21 = vor.u32 %v577_v50, %v574_v48 }
  0xaf   : > { %1142 = vrot.lane.b32.xlu0 %v3100_v63, %s2529_s18  ;;  %v1477_v6 = vsel %vm1473_vm12, %v1444_v28, %v1193_v26  ;;  %v3185_v26 = vcombine.low %v3124_v31, %v3131_v37  ;;  %v593_v35 = vrot.slane %v591_v47, 5 }
  0xb0   : > { %1175 = vrot.lane.b32.xlu1 %v3004_v41, %s2526_s5  ;;  %v1442_v41 = vsel %vm1440_vm11, %v1409_v40, %v3045_v12  ;;  %v581_v12 = vshll.u32 %v3131_v37, 16  ;;  %v579_v0 = vrot.slane %v578_v21, 4  ;;  %v3262_v21 = vld [vmem:[%s2615_s30 + $0xb0] sm:$0x1] }
  0xb1   : > { %v1226_v7 = vpop.permute.xlu0 %1225  ;;  %v1475_v55 = vsel %vm1473_vm12, %v1442_v41, %v1191_v38  ;;  %v2133_v41 = vrot.slane %v3124_v31, 9 }
  0xb2   : > { %v1228_v43 = vpop.permute.xlu1 %1227  ;;  %v1508_v60 = vsel %vm1506_vm13, %v1475_v55, %v1226_v7  ;;  %v583_v19 = vrot.slane %v581_v12, 5 }
  0xb3   : > { %1235 = vrot.lane.b32.xlu0 %v3117_v30, %s2531_s21  ;;  %v1510_v3 = vsel %vm1506_vm13, %v1477_v6, %v1228_v43 }
  0xb4   : > { %1268 = vrot.lane.b32.xlu1 %v3059_v20, %s2532_s23  ;;  %v588_v10 = vor.u32 %v587_v23, %v583_v19  ;;  %v584_v49 = vsel %vm2672_vm5, %v579_v0, %v583_v19 }
  0xb5   : > { %v1261_v62 = vpop.permute.xlu0 %1260 }
  0xb6   : > { %v3154_v2 = vpop.permute.xlu1 %974  ;;  %v1541_v9 = vsel %vm1539_vm14, %v1508_v60, %v1261_v62  ;;  %v589_v17 = vrot.slane %v588_v10, 4 }
  0xb7   : > { %982 = vrot.lane.b32.xlu0 %v3026_v22, %s2528_s7  ;;  %2246 = vmatprep.mubr.msk.bf16.mxu0 %vm1592_vm15, %v1541_v9  ;;  %v3240_v9 = vld [vmem:[%s2615_s30 + $0xa8] sm:$0xf]  ;;  %v1301_v47 = vsel %vm1292_vm7, %v2627_v4, %v3154_v2 }
  0xb8   : > { %1177 = vrot.lane.b32.xlu1 %v3135_v44, %s2526_s5  ;;  %v594_v1 = vsel %vm2672_vm5, %v589_v17, %v593_v35  ;;  %v596_v48 = vshrl.u32 %v3240_v9, 16  ;;  %v615_v17 = vshll.u32 %v3262_v21, 16 }
  0xb9   : > { %v1263_v27 = vpop.permute.xlu0 %1262  ;;  %v3204_v43 = vcombine.low %v584_v49, %v594_v1 }
  0xba   : > { %v3169_v18 = vpop.permute.xlu1 %976  ;;  %v1543_v22 = vsel %vm1539_vm14, %v1510_v3, %v1263_v27  ;;  %v598_v3 = vrot.slane %v596_v48, 4 }
  0xbb   : > { %1210 = vrot.lane.b32.xlu0 %v3071_v8, %s2530_s19  ;;  %2247 = vmatmul.mubr.msk.bf16.vlgmr.msra.gmra.mrb[0].mxu0 %vm1592_vm15, %v1543_v22 }
  0xbc   : > { %1270 = vrot.lane.b32.xlu1 %v3162_v15, %s2532_s23 }
  0xbd   : > { %v3177_v38 = vpop.permute.xlu0 %1054 }
  0xbe   : > { %v3179_v29 = vpop.permute.xlu1 %1056  ;;  %v1347_v35 = vsel %vm1341_vm8, %v1301_v47, %v3177_v38 }
  0xbf   : > { %984 = vrot.lane.b32.xlu0 %v3117_v30, %s2528_s7 }
  0xc0   : > { %1062 = vrot.lane.b32.xlu1 %v3059_v20, %s2527_s6  ;;  %v787_v20 = vrot.slane %v3131_v37, 5 }
  0xc1   : > { %v1090_v61 = vpop.permute.xlu0 %1089 }
  0xc2   : > { %v3189_v40 = vpop.permute.xlu1 %986  ;;  %v789_v36 = vrot.slane %v787_v20, 4  ;;  %v788_v54 = vsel %vm2637_vm4, %v2133_v41, %v787_v20  ;;  %v1380_v1 = vsel %vm1374_vm9, %v1347_v35, %v1090_v61 }
  0xc3   : > { %1212 = vrot.lane.b32.xlu0 %v3185_v26, %s2530_s19 }
  0xc4   : > { %1245 = vrot.lane.b32.xlu1 %v3100_v63, %s2531_s21  ;;  %v791_v31 = vsel %vm2637_vm4, %v789_v36, %v790_v53  ;;  %v617_v53 = vrot.slane %v615_v17, 5  ;;  %v797_v17 = vrot.slane %v3262_v21, 5 }
  0xc5   : > { %v3199_v39 = vpop.permute.xlu0 %1091  ;;  %v3227_v56 = vcombine.low %v788_v54, %v791_v31  ;;  %v3291_v31 = vld [vmem:[%s2615_s30 + $0xb4] sm:$0xf] }
  0xc6   : > { %v1125_v7 = vpop.permute.xlu1 %1124 }
  0xc7   : > { %1064 = vrot.lane.b32.xlu0 %v3162_v15, %s2527_s6  ;;  %v1413_v4 = vsel %vm1407_vm10, %v1380_v1, %v1125_v7 }
  0xc8   : > { %1097 = vrot.lane.b32.xlu1 %v3082_v59, %s2525_s4 }
  0xc9   : > { %v3208_v45 = vpop.permute.xlu0 %988 }
  0xca   : > { %v3211_v24 = vpop.permute.xlu1 %1066 }
  0xcb   : > { %1247 = vrot.lane.b32.xlu0 %v3204_v43, %s2531_s21 }
  0xcc   : > { %1280 = vrot.lane.b32.xlu1 %v3135_v44, %s2532_s23 }
  0xcd   : > { %v3217_v37 = vpop.permute.xlu0 %1126 }
  0xce   : > { %v1160_v55 = vpop.permute.xlu1 %1159 }
  0xcf   : > { %994 = vrot.lane.b32.xlu0 %v3100_v63, %s2528_s7  ;;  %v3243_v63 = vld [vmem:[%s2615_s30 + $0xac] sm:$0xf]  ;;  %v1446_v41 = vsel %vm1440_vm11, %v1413_v4, %v1160_v55 }
  0xd0   : > { %1099 = vrot.lane.b32.xlu1 %v2944_v42, %s2525_s4  ;;  %v605_v6 = vshll.u32 %v3243_v63, 16  ;;  %v609_v50 = vshrl.u32 %v3243_v63, 16  ;;  %v3284_v2 = vcombine.low %v3240_v9, %v3243_v63  ;;  %v794_v55 = vrot.slane %v3243_v63, 5 }
  0xd1   : > { %v3229_v12 = vpop.permute.xlu0 %1068  ;;  %v620_v63 = vshrl.u32 %v3291_v31, 16 }
  0xd2   : > { %v3231_v60 = vpop.permute.xlu1 %1101  ;;  %v607_v27 = vrot.slane %v605_v6, 5  ;;  %v611_v25 = vrot.slane %v609_v50, 4  ;;  %v1304_v50 = vsel %vm1292_vm7, %v2738_v51, %v3169_v18  ;;  %v623_v51 = vshll.u32 %v3291_v31, 16 }
  0xd3   : > { %1132 = vrot.lane.b32.xlu0 %v3117_v30, %s2529_s18  ;;  %v599_v30 = vshll.u32 %v3240_v9, 16  ;;  %v622_v35 = vrot.slane %v620_v63, 4 }
  0xd4   : > { %1282 = vrot.lane.b32.xlu1 %v3227_v56, %s2532_s23  ;;  %v625_v4 = vrot.slane %v623_v51, 5 }
  0xd5   : > { %v3237_v62 = vpop.permute.xlu0 %1161 }
  0xd6   : > { %v1195_v28 = vpop.permute.xlu1 %1194  ;;  %v626_v21 = vor.u32 %v625_v4, %v622_v35 }
  0xd7   : > { %996 = vrot.lane.b32.xlu0 %v3204_v43, %s2528_s7  ;;  %v1479_v61 = vsel %vm1473_vm12, %v1446_v41, %v1195_v28 }
  0xd8   : > { %1074 = vrot.lane.b32.xlu1 %v3135_v44, %s2527_s6  ;;  %v601_v44 = vrot.slane %v599_v30, 5  ;;  %v3295_v30 = vld [vmem:[%s2615_s30 + $0xb8] sm:$0xf] }
  0xd9   : > { %v3253_v19 = vpop.permute.xlu0 %1103  ;;  %v633_v18 = vshrl.u32 %v3295_v30, 16  ;;  %v801_v63 = vrot.slane %v3295_v30, 5 }
  0xda   : > { %v3255_v23 = vpop.permute.xlu1 %1136  ;;  %v602_v0 = vor.u32 %v601_v44, %v598_v3  ;;  %v1349_v44 = vsel %vm1341_vm8, %v1304_v50, %v3179_v29 }
  0xdb   : > { %1134 = vrot.lane.b32.xlu0 %v2801_v46, %s2529_s18  ;;  %v635_v41 = vrot.slane %v633_v18, 4 }
  0xdc   : > { %1167 = vrot.lane.b32.xlu1 %v3162_v15, %s2526_s5  ;;  %v612_v15 = vor.u32 %v611_v25, %v607_v27  ;;  %v603_v38 = vrot.slane %v602_v0, 4  ;;  %v2134_v0 = vrot.slane %v3240_v9, 9 }
  0xdd   : > { %v1197_v22 = vpop.permute.xlu0 %1196 }
  0xde   : > { %v1230_v10 = vpop.permute.xlu1 %1229  ;;  %v613_v36 = vrot.slane %v612_v15, 4  ;;  %v608_v28 = vsel %vm2672_vm5, %v603_v38, %v607_v27 }
  0xdf   : > { %1076 = vrot.lane.b32.xlu0 %v3227_v56, %s2527_s6  ;;  %v1512_v7 = vsel %vm1506_vm13, %v1479_v61, %v1230_v10  ;;  %v1382_v10 = vsel %vm1374_vm9, %v1349_v44, %v3199_v39  ;;  %v796_v39 = vrot.slane %v794_v55, 4  ;;  %v3371_v44 = vld [vmem:[%s2615_s30 + $0xc0] sm:$0xf] }
  0xe0   : > { %1109 = vrot.lane.b32.xlu1 %v3185_v26, %s2525_s4  ;;  %v618_v3 = vsel %vm2672_vm5, %v613_v36, %v617_v53  ;;  %v1415_v47 = vsel %vm1407_vm10, %v1382_v10, %v3217_v37  ;;  %v249_v53 = vld [vmem:[%s2615_s30 + $0xbc] sm:$0x1] }
  0xe1   : > { %v3274_v49 = vpop.permute.xlu0 %1138  ;;  %v3328_v29 = vcombine.low %v608_v28, %v618_v3  ;;  %v1448_v15 = vsel %vm1440_vm11, %v1415_v47, %v3237_v62  ;;  %v798_v62 = vsel %vm2637_vm4, %v796_v39, %v797_v17  ;;  %v2135_v47 = vrot.slane %v3291_v31, 9 }
  0xe2   : > { %v3277_v20 = vpop.permute.xlu1 %1171  ;;  %v1481_v37 = vsel %vm1473_vm12, %v1448_v15, %v1197_v22  ;;  %v804_v15 = vrot.slane %v249_v53, 5  ;;  %v807_v39 = vshrl.u32 %v3371_v44, 16  ;;  %v810_v17 = vshll.u32 %v3371_v44, 16 }
  0xe3   : > { %1169 = vrot.lane.b32.xlu0 %v2831_v16, %s2526_s5 }
  0xe4   : > { %1202 = vrot.lane.b32.xlu1 %v2944_v42, %s2530_s19 }
  0xe5   : > { %v1232_v54 = vpop.permute.xlu0 %1231 }
  0xe6   : > { %v1265_v48 = vpop.permute.xlu1 %1264  ;;  %v1514_v38 = vsel %vm1506_vm13, %v1481_v37, %v1232_v54 }
  0xe7   : > { %v1545_v6 = vsel %vm1539_vm14, %v1512_v7, %v1265_v48  ;;  %1111 = vrot.lane.b32.xlu0 %v3284_v2, %s2525_s4  ;;  %v639_v7 = vshll.u32 %v249_v53, 16  ;;  %v1322_v53 = vsel %vm1292_vm7, %v2867_v33, %v3208_v45 }
  0xe8   : > { %1144 = vrot.lane.b32.xlu1 %v3204_v43, %s2529_s18  ;;  %2250 = vmatprep.mubr.msk.bf16.mxu0 %vm1592_vm15, %v1545_v6  ;;  %v629_v43 = vshll.u32 %v3295_v30, 16 }
  0xe9   : > { %v3314_v25 = vpop.permute.xlu0 %978  ;;  %v641_v28 = vrot.slane %v639_v7, 5 }
  0xea   : > { %v3321_v27 = vpop.permute.xlu1 %1173  ;;  %v631_v9 = vrot.slane %v629_v43, 5  ;;  %v1307_v52 = vsel %vm1292_vm7, %v2811_v11, %v3314_v25 }
  0xeb   : > { %1204 = vrot.lane.b32.xlu0 %v2867_v33, %s2530_s19 }
  0xec   : > { %1237 = vrot.lane.b32.xlu1 %v2801_v46, %s2531_s21  ;;  %v795_v46 = vsel %vm2637_vm4, %v2134_v0, %v794_v55  ;;  %v636_v54 = vor.u32 %v635_v41, %v631_v9  ;;  %v627_v55 = vrot.slane %v626_v21, 4  ;;  %v803_v0 = vrot.slane %v801_v63, 4 }
  0xed   : > { %v1207_v1 = vpop.permute.xlu0 %1206  ;;  %v802_v41 = vsel %vm2637_vm4, %v2135_v47, %v801_v63 }
  0xee   : > { %v1267_v36 = vpop.permute.xlu1 %1266  ;;  %v637_v50 = vrot.slane %v636_v54, 4  ;;  %v632_v43 = vsel %vm2672_vm5, %v627_v55, %v631_v9  ;;  %v252_v54 = vld [vmem:[%s2615_s30 + $0xc8] sm:$0x1] }
  0xef   : > { %v1547_v61 = vsel %vm1539_vm14, %v1514_v38, %v1267_v36  ;;  %1146 = vrot.lane.b32.xlu0 %v3328_v29, %s2529_s18  ;;  %v809_v38 = vrot.slane %v807_v39, 4  ;;  %v812_v36 = vrot.slane %v810_v17, 5 }
  0xf0   : > { %1179 = vrot.lane.b32.xlu1 %v3227_v56, %s2526_s5  ;;  %2251 = vmatmul.mubr.msk.bf16.gmra.mrb[4].mxu0 %vm1592_vm15, %v1547_v61  ;;  %v3354_v56 = vcombine.low %v795_v46, %v798_v62  ;;  %v1361_v62 = vsel %vm1341_vm8, %v1322_v53, %v3229_v12 }
  0xf1   : > { %v3348_v22 = vpop.permute.xlu0 %980  ;;  %v1394_v33 = vsel %vm1374_vm9, %v1361_v62, %v3253_v19 }
  0xf2   : > { %v3350_v48 = vpop.permute.xlu1 %1058  ;;  %v1427_v7 = vsel %vm1407_vm10, %v1394_v33, %v3274_v49 }
  0xf3   : > { %1239 = vrot.lane.b32.xlu0 %v2827_v14, %s2531_s21  ;;  %v1319_v14 = vsel %vm1292_vm7, %v2944_v42, %v3189_v40  ;;  %v642_v42 = vsel %vm2672_vm5, %v637_v50, %v641_v28  ;;  %v3382_v40 = vld [vmem:[%s2615_s30 + $0xc4] sm:$0xf]  ;;  %v813_v50 = vor.u32 %v812_v36, %v809_v38  ;;  %v1460_v12 = vsel %vm1440_vm11, %v1427_v7, %v3321_v27 }
  0xf4   : > { %1272 = vrot.lane.b32.xlu1 %v2831_v16, %s2532_s23  ;;  %v3368_v16 = vcombine.low %v3291_v31, %v3295_v30  ;;  %v1359_v51 = vsel %vm1341_vm8, %v1319_v14, %v3211_v24  ;;  %v820_v31 = vshrl.u32 %v3382_v40, 16  ;;  %v3439_v14 = vld [vmem:[%s2615_s30 + $0xcc] sm:$0xf] }
  0xf5   : > { %v1209_v6 = vpop.permute.xlu0 %1208  ;;  %v1392_v10 = vsel %vm1374_vm9, %v1359_v51, %v3231_v60  ;;  %v3399_v60 = vcombine.low %v632_v43, %v642_v42  ;;  %v3443_v43 = vld [vmem:[%s2615_s30 + $0xd0] sm:$0xf]  ;;  %v814_v27 = vrot.slane %v813_v50, 4  ;;  %v844_v47 = vshll.u32 %v3439_v14, 16 }
  0xf6   : > { %v1242_v3 = vpop.permute.xlu1 %1241  ;;  %v1425_v24 = vsel %vm1407_vm10, %v1392_v10, %v3255_v23  ;;  %v816_v23 = vshll.u32 %v3382_v40, 16  ;;  %v822_v46 = vrot.slane %v820_v31, 4  ;;  %v1493_v19 = vsel %vm1473_vm12, %v1460_v12, %v1209_v6 }
  0xf7   : > { %1181 = vrot.lane.b32.xlu0 %v3354_v56, %s2526_s5  ;;  %v1458_v35 = vsel %vm1440_vm11, %v1425_v24, %v3277_v20  ;;  %v841_v10 = vshrl.u32 %v3439_v14, 16  ;;  %v835_v24 = vrot.slane %v3382_v40, 5  ;;  %v850_v39 = vshll.u32 %v3443_v43, 16 }
  0xf8   : > { %1214 = vrot.lane.b32.xlu1 %v3284_v2, %s2530_s19  ;;  %v1491_v37 = vsel %vm1473_vm12, %v1458_v35, %v1207_v1  ;;  %v805_v1 = vsel %vm2637_vm4, %v803_v0, %v804_v15  ;;  %v818_v61 = vrot.slane %v816_v23, 5  ;;  %v854_v15 = vshrl.u32 %v3443_v43, 16 }
  0xf9   : > { %v3375_v18 = vpop.permute.xlu0 %1060  ;;  %v1524_v4 = vsel %vm1506_vm13, %v1491_v37, %v1242_v3  ;;  %v2185_v55 = vcombine.low %v802_v41, %v805_v1  ;;  %v826_v3 = vshll.u32 %v252_v54, 16  ;;  %v2186_v35 = vcombine.low %v3371_v44, %v3382_v40  ;;  %v255_v40 = vld [vmem:[%s2615_s30 + $0xd4] sm:$0x1]  ;;  %s2216_s30 = sshll.u32 %s2515_s15, 5 }
  0xfa   : > { %v3386_v30 = vpop.permute.xlu1 %1093  ;;  %v823_v28 = vor.u32 %v822_v46, %v818_v61  ;;  %v819_v31 = vsel %vm2672_vm5, %v814_v27, %v818_v61  ;;  %v2136_v37 = vrot.slane %v3371_v44, 9  ;;  %v838_v41 = vrot.slane %v252_v54, 5  ;;  %s3684_s8 = scalar_lea.hbm %s3766_s3, %s2216_s30 }
  0xfb   : > { %1274 = vrot.lane.b32.xlu0 %v2869_v34, %s2532_s23  ;;  %v828_v6 = vrot.slane %v826_v3, 5  ;;  %v856_v38 = vrot.slane %v854_v15, 4  ;;  %v860_v54 = vshll.u32 %v255_v40, 16 }
  0xfc   : > { %1216 = vrot.lane.b32.xlu1 %v3368_v16, %s2530_s19  ;;  %v836_v44 = vsel %vm2637_vm4, %v2136_v37, %v835_v24 }
  0xfd   : > { %v1244_v34 = vpop.permute.xlu0 %1243  ;;  %v862_v3 = vrot.slane %v860_v54, 5 }
  0xfe   : > { %v1277_v9 = vpop.permute.xlu1 %1276  ;;  %v1526_v49 = vsel %vm1506_vm13, %v1493_v19, %v1244_v34  ;;  %v843_v34 = vrot.slane %v841_v10, 4  ;;  %v869_v19 = vrot.slane %v3443_v43, 5  ;;  %v872_v10 = vrot.slane %v255_v40, 5 }
  0xff   : > { %1249 = vrot.lane.b32.xlu0 %v3328_v29, %s2531_s21  ;;  %v1557_v20 = vsel %vm1539_vm14, %v1524_v4, %v1277_v9  ;;  %v846_v4 = vrot.slane %v844_v47, 5 }
 0x100   : > { %1251 = vrot.lane.b32.xlu1 %v3399_v60, %s2531_s21  ;;  %2262 = vmatprep.mubr.msk.bf16.mxu1 %vm1592_vm15, %v1557_v20  ;;  %v837_v20 = vrot.slane %v835_v24, 4 }
 0x101   : > { %v3420_v21 = vpop.permute.xlu0 %990  ;;  %v847_v1 = vor.u32 %v846_v4, %v843_v34 }
 0x102   : > { %v3425_v45 = vpop.permute.xlu1 %1095  ;;  %v839_v46 = vsel %vm2637_vm4, %v837_v20, %v838_v41 }
 0x103   : > { %1284 = vrot.lane.b32.xlu0 %v3354_v56, %s2532_s23  ;;  %v2188_v7 = vcombine.low %v836_v44, %v839_v46  ;;  %v848_v50 = vrot.slane %v847_v1, 4 }
 0x104   : > { %998 = vrot.lane.b32.xlu1 %v3328_v29, %s2528_s7  ;;  %v824_v29 = vrot.slane %v823_v28, 4 }
 0x105   : > { %v3436_v63 = vpop.permute.xlu0 %1128 }
 0x106   : > { %v1279_v51 = vpop.permute.xlu1 %1278  ;;  %v829_v23 = vsel %vm2672_vm5, %v824_v29, %v828_v6  ;;  %v2137_v29 = vrot.slane %v3439_v14, 9  ;;  %v871_v6 = vrot.slane %v869_v19, 4 }
 0x107   : > { %v1559_v42 = vsel %vm1539_vm14, %v1526_v49, %v1279_v51  ;;  %1286 = vrot.lane.b32.xlu0 %v2185_v55, %s2532_s23  ;;  %v2187_v53 = vcombine.low %v819_v31, %v829_v23  ;;  %v2189_v51 = vcombine.low %v3439_v14, %v3443_v43 }
 0x108   : > { %1000 = vrot.lane.b32.xlu1 %v3399_v60, %s2528_s7  ;;  %2263 = vmatmul.mubr.msk.bf16.vlgmr.msra.gmra.mrb[0].mxu1 %vm1592_vm15, %v1559_v42  ;;  %v870_v43 = vsel %vm2637_vm4, %v2137_v29, %v869_v19  ;;  %v873_v15 = vsel %vm2637_vm4, %v871_v6, %v872_v10 }
 0x109   : > { %v3452_v0 = vpop.permute.xlu0 %992  ;;  %v2191_v14 = vcombine.low %v870_v43, %v873_v15 }
 0x10a   : > { %v3457_v17 = vpop.permute.xlu1 %1070 }
 0x10b   : > { %1078 = vrot.lane.b32.xlu0 %v3354_v56, %s2527_s6  ;;  %v852_v56 = vrot.slane %v850_v39, 5 }
 0x10c   : > { %1080 = vrot.lane.b32.xlu1 %v2185_v55, %s2527_s6 }
 0x10d   : > { %v3469_v9 = vpop.permute.xlu0 %1130  ;;  %v857_v62 = vor.u32 %v856_v38, %v852_v56 }
 0x10e   : > { %v1164_v36 = vpop.permute.xlu1 %1163 }
 0x10f   : > { %1113 = vrot.lane.b32.xlu0 %v3368_v16, %s2525_s4  ;;  %v858_v28 = vrot.slane %v857_v62, 4 }
 0x110   : > { %1115 = vrot.lane.b32.xlu1 %v2186_v35, %s2525_s4  ;;  %s190_s4 = scalar_lea.vmem [#allocation4], %s2118_s29 }
 0x111   : > { %v3475_v61 = vpop.permute.xlu0 %1072  ;;  %v863_v27 = vsel %vm2672_vm5, %v858_v28, %v862_v3 }
 0x112   : > { %v3481_v33 = vpop.permute.xlu1 %1105 }
 0x113   : > { %1148 = vrot.lane.b32.xlu0 %v3399_v60, %s2529_s18  ;;  %v853_v60 = vsel %vm2672_vm5, %v848_v50, %v852_v56 }
 0x114   : > { %1150 = vrot.lane.b32.xlu1 %v2187_v53, %s2529_s18  ;;  %s2417_s18 = sshll.u32 %s2533_s11, 4  ;;  %s2418_s18 = int_to_ptr.vmem [resolvable:$false] %s2417_s18 }
 0x115   : > { %v1166_v12 = vpop.permute.xlu0 %1165 }
 0x116   : > { %v1199_v49 = vpop.permute.xlu1 %1198 }
 0x117   : > { %1183 = vrot.lane.b32.xlu0 %v2185_v55, %s2526_s5  ;;  %v2190_v55 = vcombine.low %v853_v60, %v863_v27 }
 0x118   : > { %1185 = vrot.lane.b32.xlu1 %v2188_v7, %s2526_s5  ;;  %s2007_s5 = sshll.u32 %s190_s4, 4  ;;  %s3686_s5 = int_to_ptr.vmem [resolvable:$true] %s2007_s5 }
 0x119   : > { %v3493_v42 = vpop.permute.xlu0 %1107  ;;  %s2413_s10 = scalar_lea.vmem %s3686_s5, 32  ;;  %p2420_p1 = scmp.lt.s32.totalorder %s3686_s5, %s2418_s18 }
 0x11a   : > { %v1141_v47 = vpop.permute.xlu1 %1140  ;;  %p2414_p12 = scmp.ne.s32.totalorder %s3686_s5, %s2413_s10 }
 0x11b   : > { %1218 = vrot.lane.b32.xlu0 %v2186_v35, %s2530_s19  ;;  %v1351_v35 = vsel %vm1341_vm8, %v1307_v52, %v3350_v48 }
 0x11c   : > { %1220 = vrot.lane.b32.xlu1 %v2189_v51, %s2530_s19  ;;  %v1384_v23 = vsel %vm1374_vm9, %v1351_v35, %v3386_v30  ;;  %v1310_v30 = vsel %vm1292_vm7, %v2905_v5, %v3348_v22  ;;  %p2415_p13 = pnand %p2414_p12, %p2595_p4  ;;  %s2419_s19 = scalar_lea.vmem %s2418_s18, 64 }
 0x11d   : > { %v1201_v24 = vpop.permute.xlu0 %1200  ;;  %v1417_v13 = vsel %vm1407_vm10, %v1384_v23, %v3436_v63  ;;  %v1353_v63 = vsel %vm1341_vm8, %v1310_v30, %v3375_v18  ;;  %p2421_p2 = scmp.lt.s32.totalorder %s2419_s19, %s2413_s10 }
 0x11e   : > { %v1234_v39 = vpop.permute.xlu1 %1233  ;;  %v1450_v34 = vsel %vm1440_vm11, %v1417_v13, %v1164_v36  ;;  %v1386_v56 = vsel %vm1374_vm9, %v1353_v63, %v3425_v45  ;;  %p2416_p0 = pneg %p2415_p13 }
 0x11f   : > { %1253 = vrot.lane.b32.xlu0 %v2187_v53, %s2531_s21  ;;  %v1483_v11 = vsel %vm1473_vm12, %v1450_v34, %v1199_v49  ;;  %v1419_v36 = vsel %vm1407_vm10, %v1386_v56, %v3469_v9  ;;  %v1325_v9 = vsel %vm1292_vm7, %v2897_v58, %v3420_v21  ;;  %v1328_v21 = vsel %vm1292_vm7, %v2969_v57, %v3452_v0  ;;  %p2422_p3 = por %p2421_p2, %p2420_p1 }
 0x120   : > { %1255 = vrot.lane.b32.xlu1 %v2190_v55, %s2531_s21  ;;  %v1516_v4 = vsel %vm1506_vm13, %v1483_v11, %v1234_v39  ;;  %v1452_v40 = vsel %vm1440_vm11, %v1419_v36, %v1166_v12  ;;  %v1363_v54 = vsel %vm1341_vm8, %v1325_v9, %v3457_v17  ;;  %v1365_v17 = vsel %vm1341_vm8, %v1328_v21, %v3475_v61 }
 0x121   : > { %v1143_v31 = vpop.permute.xlu0 %1142  ;;  %v1485_v53 = vsel %vm1473_vm12, %v1452_v40, %v1201_v24  ;;  %v1396_v50 = vsel %vm1374_vm9, %v1363_v54, %v3481_v33  ;;  %v1398_v27 = vsel %vm1374_vm9, %v1365_v17, %v3493_v42  ;;  %p2423_p5 = pnand %p2422_p3, %p2416_p0 }
 0x122   : > { %v1176_v37 = vpop.permute.xlu1 %1175  ;;  %v1429_v28 = vsel %vm1407_vm10, %v1396_v50, %v1141_v47  ;;  %v1431_v6 = vsel %vm1407_vm10, %v1398_v27, %v1143_v31 }
 0x123   : > { %1288 = vrot.lane.b32.xlu0 %v2188_v7, %s2532_s23  ;;  %v1462_v3 = vsel %vm1440_vm11, %v1429_v28, %v1176_v37 }
 0x124   : > { %1290 = vrot.lane.b32.xlu1 %v2191_v14, %s2532_s23 }
 0x125   : > { %v1236_v25 = vpop.permute.xlu0 %1235 }
 0x126   : > { %v1269_v48 = vpop.permute.xlu1 %1268  ;;  %v1518_v5 = vsel %vm1506_vm13, %v1485_v53, %v1236_v25 }
 0x127   : > { %v1549_v20 = vsel %vm1539_vm14, %v1516_v4, %v1269_v48 }
 0x128   : > { %2254 = vmatprep.mubr.msk.bf16.mxu0 %vm1592_vm15, %v1549_v20 }
 0x129   : > { %v983_v41 = vpop.permute.xlu0 %982 }
 0x12a   : > { %v1178_v38 = vpop.permute.xlu1 %1177  ;;  %v1313_v34 = vsel %vm1292_vm7, %v2994_v32, %v983_v41 }
 0x12b   : > { %v1464_v10 = vsel %vm1440_vm11, %v1431_v6, %v1178_v38 }
 0x12d   : > { %v1211_v1 = vpop.permute.xlu0 %1210 }
 0x12e   : > { %v1271_v22 = vpop.permute.xlu1 %1270  ;;  %v1495_v19 = vsel %vm1473_vm12, %v1462_v3, %v1211_v1 }
 0x12f   : > { %v1551_v44 = vsel %vm1539_vm14, %v1518_v5, %v1271_v22 }
 0x130   : > { %2255 = vmatmul.mubr.msk.bf16.gmra.mrb[8].mxu0 %vm1592_vm15, %v1551_v44 }
 0x131   : > { %v985_v18 = vpop.permute.xlu0 %984 }
 0x132   : > { %v1063_v46 = vpop.permute.xlu1 %1062  ;;  %v1316_v40 = vsel %vm1292_vm7, %v3082_v59, %v985_v18 }
 0x133   : > { %v1355_v11 = vsel %vm1341_vm8, %v1313_v34, %v1063_v46 }
 0x135   : > { %v1213_v62 = vpop.permute.xlu0 %1212 }
 0x136   : > { %v1246_v45 = vpop.permute.xlu1 %1245  ;;  %v1497_v47 = vsel %vm1473_vm12, %v1464_v10, %v1213_v62 }
 0x137   : > { %v1528_v51 = vsel %vm1506_vm13, %v1495_v19, %v1246_v45 }
 0x139   : > { %v1065_v7 = vpop.permute.xlu0 %1064 }
 0x13a   : > { %v1098_v12 = vpop.permute.xlu1 %1097  ;;  %v1357_v41 = vsel %vm1341_vm8, %v1316_v40, %v1065_v7 }
 0x13b   : > { %v1388_v4 = vsel %vm1374_vm9, %v1355_v11, %v1098_v12 }
 0x13d   : > { %v1248_v49 = vpop.permute.xlu0 %1247 }
 0x13e   : > { %v1281_v60 = vpop.permute.xlu1 %1280  ;;  %v1530_v24 = vsel %vm1506_vm13, %v1497_v47, %v1248_v49 }
 0x13f   : > { %v1561_v58 = vsel %vm1539_vm14, %v1528_v51, %v1281_v60 }
 0x140   : > { %2266 = vmatprep.mubr.msk.bf16.mxu1 %vm1592_vm15, %v1561_v58 }
 0x141   : > { %v995_v33 = vpop.permute.xlu0 %994 }
 0x142   : > { %v1100_v29 = vpop.permute.xlu1 %1099  ;;  %v1331_v9 = vsel %vm1292_vm7, %v3071_v8, %v995_v33 }
 0x143   : > { %v1390_v53 = vsel %vm1374_vm9, %v1357_v41, %v1100_v29 }
 0x145   : > { %v1133_v55 = vpop.permute.xlu0 %1132 }
 0x146   : > { %v1283_v57 = vpop.permute.xlu1 %1282  ;;  %v1421_v20 = vsel %vm1407_vm10, %v1388_v4, %v1133_v55 }
 0x147   : > { %v1563_v0 = vsel %vm1539_vm14, %v1530_v24, %v1283_v57 }
 0x148   : > { %2267 = vmatmul.mubr.msk.bf16.gmra.mrb[4].mxu1 %vm1592_vm15, %v1563_v0 }
 0x149   : > { %v997_v61 = vpop.permute.xlu0 %996 }
 0x14a   : > { %v1075_v43 = vpop.permute.xlu1 %1074  ;;  %v1334_v3 = vsel %vm1292_vm7, %v3185_v26, %v997_v61 }
 0x14b   : > { %v1367_v54 = vsel %vm1341_vm8, %v1331_v9, %v1075_v43 }
 0x14d   : > { %v1135_v15 = vpop.permute.xlu0 %1134 }
 0x14e   : > { %v1168_v39 = vpop.permute.xlu1 %1167  ;;  %v1423_v5 = vsel %vm1407_vm10, %v1390_v53, %v1135_v15 }
 0x14f   : > { %v1454_v30 = vsel %vm1440_vm11, %v1421_v20, %v1168_v39 }
 0x151   : > { %v1077_v42 = vpop.permute.xlu0 %1076 }
 0x152   : > { %v1110_v52 = vpop.permute.xlu1 %1109  ;;  %v1369_v49 = vsel %vm1341_vm8, %v1334_v3, %v1077_v42 }
 0x153   : > { %v1400_v7 = vsel %vm1374_vm9, %v1367_v54, %v1110_v52 }
 0x155   : > { %v1170_v14 = vpop.permute.xlu0 %1169 }
 0x156   : > { %v1203_v35 = vpop.permute.xlu1 %1202  ;;  %v1456_v44 = vsel %vm1440_vm11, %v1423_v5, %v1170_v14 }
 0x157   : > { %v1487_v63 = vsel %vm1473_vm12, %v1454_v30, %v1203_v35 }
 0x159   : > { %v1112_v31 = vpop.permute.xlu0 %1111 }
 0x15a   : > { %v1145_v23 = vpop.permute.xlu1 %1144  ;;  %v1402_v8 = vsel %vm1374_vm9, %v1369_v49, %v1112_v31 }
 0x15b   : > { %v1433_v12 = vsel %vm1407_vm10, %v1400_v7, %v1145_v23 }
 0x15d   : > { %v1205_v37 = vpop.permute.xlu0 %1204 }
 0x15e   : > { %v1238_v13 = vpop.permute.xlu1 %1237  ;;  %v1489_v46 = vsel %vm1473_vm12, %v1456_v44, %v1205_v37 }
 0x15f   : > { %v1520_v38 = vsel %vm1506_vm13, %v1487_v63, %v1238_v13 }
 0x161   : > { %v1147_v25 = vpop.permute.xlu0 %1146 }
 0x162   : > { %v1180_v48 = vpop.permute.xlu1 %1179  ;;  %v1435_v21 = vsel %vm1407_vm10, %v1402_v8, %v1147_v25 }
 0x163   : > { %v1466_v19 = vsel %vm1440_vm11, %v1433_v12, %v1180_v48 }
 0x165   : > { %v1240_v56 = vpop.permute.xlu0 %1239 }
 0x166   : > { %v1273_v36 = vpop.permute.xlu1 %1272  ;;  %v1522_v62 = vsel %vm1506_vm13, %v1489_v46, %v1240_v56 }
 0x167   : > { %v1553_v32 = vsel %vm1539_vm14, %v1520_v38, %v1273_v36 }
 0x168   : > { %2258 = vmatprep.mubr.msk.bf16.mxu0 %vm1592_vm15, %v1553_v32 }
 0x169   : > { %v1182_v1 = vpop.permute.xlu0 %1181 }
 0x16a   : > { %v1215_v22 = vpop.permute.xlu1 %1214  ;;  %v1468_v27 = vsel %vm1440_vm11, %v1435_v21, %v1182_v1 }
 0x16b   : > { %v1499_v51 = vsel %vm1473_vm12, %v1466_v19, %v1215_v22 }
 0x16d   : > { %v1275_v45 = vpop.permute.xlu0 %1274 }
 0x16e   : > { %v1217_v59 = vpop.permute.xlu1 %1216  ;;  %v1555_v18 = vsel %vm1539_vm14, %v1522_v62, %v1275_v45 }
 0x16f   : > { %2259 = vmatmul.mubr.msk.bf16.gmra.mrb[12].mxu0 %vm1592_vm15, %v1555_v18  ;;  %v1501_v26 = vsel %vm1473_vm12, %v1468_v27, %v1217_v59 }
 0x171   : > { %v1250_v50 = vpop.permute.xlu0 %1249 }
 0x172   : > { %v1252_v28 = vpop.permute.xlu1 %1251  ;;  %v1532_v60 = vsel %vm1506_vm13, %v1499_v51, %v1250_v50 }
 0x173   : > { %v1534_v29 = vsel %vm1506_vm13, %v1501_v26, %v1252_v28 }
 0x175   : > { %v1285_v58 = vpop.permute.xlu0 %1284 }
 0x176   : > { %v999_v17 = vpop.permute.xlu1 %998  ;;  %v1565_v33 = vsel %vm1539_vm14, %v1532_v60, %v1285_v58 }
 0x177   : > { %2270 = vmatprep.mubr.msk.bf16.mxu1 %vm1592_vm15, %v1565_v33  ;;  %v1337_v52 = vsel %vm1292_vm7, %v3284_v2, %v999_v17 }
 0x179   : > { %v1287_v6 = vpop.permute.xlu0 %1286 }
 0x17a   : > { %v1001_v10 = vpop.permute.xlu1 %1000  ;;  %v1567_v47 = vsel %vm1539_vm14, %v1534_v29, %v1287_v6 }
 0x17b   : > { %2271 = vmatmul.mubr.msk.bf16.gmra.mrb[8].mxu1 %vm1592_vm15, %v1567_v47  ;;  %v1340_v31 = vsel %vm1292_vm7, %v3368_v16, %v1001_v10 }
 0x17d   : > { %v1079_v55 = vpop.permute.xlu0 %1078 }
 0x17e   : > { %v1081_v24 = vpop.permute.xlu1 %1080  ;;  %v1371_v23 = vsel %vm1341_vm8, %v1337_v52, %v1079_v55 }
 0x17f   : > { %v1373_v13 = vsel %vm1341_vm8, %v1340_v31, %v1081_v24 }
 0x181   : > { %v1114_v57 = vpop.permute.xlu0 %1113 }
 0x182   : > { %v1116_v0 = vpop.permute.xlu1 %1115  ;;  %v1404_v34 = vsel %vm1374_vm9, %v1371_v23, %v1114_v57 }
 0x183   : > { %v1406_v25 = vsel %vm1374_vm9, %v1373_v13, %v1116_v0 }
 0x185   : > { %v1149_v61 = vpop.permute.xlu0 %1148 }
 0x186   : > { %v1151_v43 = vpop.permute.xlu1 %1150  ;;  %v1437_v4 = vsel %vm1407_vm10, %v1404_v34, %v1149_v61 }
 0x187   : > { %v1439_v2 = vsel %vm1407_vm10, %v1406_v25, %v1151_v43 }
 0x189   : > { %v1184_v15 = vpop.permute.xlu0 %1183 }
 0x18a   : > { %v1186_v39 = vpop.permute.xlu1 %1185  ;;  %v1470_v36 = vsel %vm1440_vm11, %v1437_v4, %v1184_v15 }
 0x18b   : > { %v1472_v38 = vsel %vm1440_vm11, %v1439_v2, %v1186_v39 }
 0x18d   : > { %v1219_v42 = vpop.permute.xlu0 %1218 }
 0x18e   : > { %v1221_v14 = vpop.permute.xlu1 %1220  ;;  %v2248_v35 = vpop.f32.mrb[0].mxu0  ;;  %v1503_v40 = vsel %vm1473_vm12, %v1470_v36, %v1219_v42 }
 0x18f   : > { %v1663_v37 = vpop.f32.mrb[1].mxu0  ;;  %v1830_v32 = vmul.f32 %v2248_v35, %v2248_v35  ;;  %v1505_v1 = vsel %vm1473_vm12, %v1472_v38, %v1221_v14 }
 0x190   : > { %v2249_v11 = vpop.f32.mrb[2].mxu0  ;;  %v1828_v30 = vmul.f32 %v1663_v37, %v1663_v37 }
 0x191   : > { %v1666_v48 = vpop.f32.mrb[3].mxu0  ;;  %v1254_v20 = vpop.permute.xlu0 %1253  ;;  %v1831_v5 = vmul.f32 %v2249_v11, %v2249_v11 }
 0x192   : > { %v1256_v63 = vpop.permute.xlu1 %1255  ;;  %v1790_v56 = vadd.f32 %v1666_v48, %v1663_v37  ;;  %v1829_v16 = vmul.f32 %v1666_v48, %v1666_v48  ;;  %v1536_v22 = vsel %vm1506_vm13, %v1503_v40, %v1254_v20 }
 0x193   : > { %v1538_v46 = vsel %vm1506_vm13, %v1505_v1, %v1256_v63 }
 0x194   : > { %v1791_v41 = vadd.f32 %v2248_v35, %v1790_v56  ;;  %v1860_v53 = vadd.f32 %v1829_v16, %v1828_v30 }
 0x195   : > { %v1289_v44 = vpop.permute.xlu0 %1288 }
 0x196   : > { %v1861_v62 = vadd.f32 %v1860_v53, %v1830_v32  ;;  %v1291_v45 = vpop.permute.xlu1 %1290  ;;  %v1569_v59 = vsel %vm1539_vm14, %v1536_v22, %v1289_v44  ;;  %v1792_v18 = vadd.f32 %v2249_v11, %v1791_v41 }
 0x197   : > { %v1571_v9 = vsel %vm1539_vm14, %v1538_v46, %v1291_v45  ;;  %2274 = vmatprep.mubr.msk.bf16.mxu1 %vm1592_vm15, %v1569_v59 }
 0x198   : > { %2275 = vmatmul.mubr.msk.bf16.gmra.mrb[12].mxu1 %vm1592_vm15, %v1571_v9  ;;  %v1862_v54 = vadd.f32 %v1861_v62, %v1831_v5 }
 0x1c3   : > { %v2252_v7 = vpop.f32.mrb[4].mxu0 }
 0x1c4   : > { %v1679_v50 = vpop.f32.mrb[5].mxu0  ;;  %v1834_v60 = vmul.f32 %v2252_v7, %v2252_v7 }
 0x1c5   : > { %v1793_v12 = vadd.f32 %v1792_v18, %v1679_v50  ;;  %v1832_v28 = vmul.f32 %v1679_v50, %v1679_v50  ;;  %v2253_v3 = vpop.f32.mrb[6].mxu0 }
 0x1c6   : > { %v1682_v19 = vpop.f32.mrb[7].mxu0  ;;  %v1835_v17 = vmul.f32 %v2253_v3, %v2253_v3 }
 0x1c7   : > { %v1863_v49 = vadd.f32 %v1862_v54, %v1832_v28  ;;  %v1794_v51 = vadd.f32 %v1793_v12, %v1682_v19  ;;  %v1833_v8 = vmul.f32 %v1682_v19, %v1682_v19 }
 0x1c9   : > { %v1795_v58 = vadd.f32 %v2252_v7, %v1794_v51  ;;  %v1864_v21 = vadd.f32 %v1863_v49, %v1833_v8 }
 0x1cb   : > { %v1865_v33 = vadd.f32 %v1864_v21, %v1834_v60  ;;  %v1796_v27 = vadd.f32 %v2253_v3, %v1795_v58 }
 0x1cd   : > { %v1866_v26 = vadd.f32 %v1865_v33, %v1835_v17 }
 0x1db   : > { %v3622_v29 = vpop.f32.mrb[0].mxu1 }
 0x1dc   : > { %v2359_v6 = vpack.i.bf16 %v3622_v29, %v2248_v35  ;;  %v1727_v10 = vpop.f32.mrb[1].mxu1  ;;  %v1846_v8 = vmul.f32 %v3622_v29, %v3622_v29 }
 0x1dd   : > { %v2355_v47 = vpack.i.bf16 %v1727_v10, %v1663_v37  ;;  %v3625_v55 = vpop.f32.mrb[2].mxu1  ;;  %v1844_v54 = vmul.f32 %v1727_v10, %v1727_v10 }
 0x1de   : > { %v2361_v24 = vpack.i.bf16 %v3625_v55, %v2249_v11  ;;  %v1730_v57 = vpop.f32.mrb[3].mxu1 }
 0x1df   : > { %v2357_v0 = vpack.i.bf16 %v1730_v57, %v1666_v48  ;;  %2356 = vxpose.xlu0.b32.start [1/16] (narrow) %v2355_v47, 8  ;;  %v1845_v12 = vmul.f32 %v1730_v57, %v1730_v57 }
 0x1e3   : > { %2358 = vxpose.xlu0.b32.cont [2/16] (narrow) %v2357_v0, 8 }
 0x1e7   : > { %2360 = vxpose.xlu0.b32.cont [3/16] (narrow) %v2359_v6, 8 }
 0x1eb   : > { %2362 = vxpose.xlu0.b32.cont [4/16] (narrow) %v2361_v24, 8 }
 0x203   : > { %v3628_v61 = vpop.f32.mrb[8].mxu0 }
 0x204   : > { %v1695_v43 = vpop.f32.mrb[9].mxu0  ;;  %v1838_v23 = vmul.f32 %v3628_v61, %v3628_v61 }
 0x205   : > { %v1797_v15 = vadd.f32 %v1796_v27, %v1695_v43  ;;  %v1836_v39 = vmul.f32 %v1695_v43, %v1695_v43  ;;  %v3630_v42 = vpop.f32.mrb[10].mxu0 }
 0x206   : > { %v3632_v52 = vpop.f32.mrb[11].mxu0  ;;  %v1839_v34 = vmul.f32 %v3630_v42, %v3630_v42 }
 0x207   : > { %v1867_v14 = vadd.f32 %v1866_v26, %v1836_v39  ;;  %v1798_v35 = vadd.f32 %v1797_v15, %v3632_v52  ;;  %v1837_v31 = vmul.f32 %v3632_v52, %v3632_v52  ;;  %v1847_v26 = vmul.f32 %v3625_v55, %v3625_v55 }
 0x209   : > { %v1799_v37 = vadd.f32 %v3628_v61, %v1798_v35  ;;  %v1868_v13 = vadd.f32 %v1867_v14, %v1837_v31 }
 0x20b   : > { %v1869_v11 = vadd.f32 %v1868_v13, %v1838_v23  ;;  %v1800_v25 = vadd.f32 %v3630_v42, %v1799_v37 }
 0x20d   : > { %v1870_v4 = vadd.f32 %v1869_v11, %v1839_v34 }
 0x21b   : > { %v2268_v48 = vpop.f32.mrb[4].mxu1 }
 0x21c   : > { %v2367_v20 = vpack.i.bf16 %v2268_v48, %v2252_v7  ;;  %v1743_v2 = vpop.f32.mrb[5].mxu1 }
 0x21d   : > { %v2363_v30 = vpack.i.bf16 %v1743_v2, %v1679_v50  ;;  %v2269_v63 = vpop.f32.mrb[6].mxu1  ;;  %v1848_v24 = vmul.f32 %v1743_v2, %v1743_v2 }
 0x21e   : > { %v2369_v56 = vpack.i.bf16 %v2269_v63, %v2253_v3  ;;  %v1746_v16 = vpop.f32.mrb[7].mxu1  ;;  %v1851_v14 = vmul.f32 %v2269_v63, %v2269_v63 }
 0x21f   : > { %v2365_v38 = vpack.i.bf16 %v1746_v16, %v1682_v19  ;;  %2364 = vxpose.xlu0.b32.cont [5/16] (narrow) %v2363_v30, 8 }
 0x223   : > { %2366 = vxpose.xlu0.b32.cont [6/16] (narrow) %v2365_v38, 8 }
 0x227   : > { %2368 = vxpose.xlu0.b32.cont [7/16] (narrow) %v2367_v20, 8 }
 0x22b   : > { %2370 = vxpose.xlu0.b32.cont [8/16] (narrow) %v2369_v56, 8 }
 0x242   : > { %v3643_v36 = vpop.f32.mrb[12].mxu0 }
 0x243   : > { %v3645_v40 = vpop.f32.mrb[13].mxu0  ;;  %v1842_v46 = vmul.f32 %v3643_v36, %v3643_v36 }
 0x244   : > { %v1801_v32 = vadd.f32 %v1800_v25, %v3645_v40  ;;  %v1840_v41 = vmul.f32 %v3645_v40, %v3645_v40  ;;  %v3650_v53 = vpop.f32.mrb[14].mxu0 }
 0x245   : > { %v3652_v1 = vpop.f32.mrb[15].mxu0  ;;  %v1843_v59 = vmul.f32 %v3650_v53, %v3650_v53 }
 0x246   : > { %v1871_v5 = vadd.f32 %v1870_v4, %v1840_v41  ;;  %v1802_v22 = vadd.f32 %v1801_v32, %v3652_v1  ;;  %v1841_v44 = vmul.f32 %v3652_v1, %v3652_v1 }
 0x248   : > { %v1803_v62 = vadd.f32 %v3643_v36, %v1802_v22  ;;  %v1872_v45 = vadd.f32 %v1871_v5, %v1841_v44 }
 0x24a   : > { %v1804_v18 = vadd.f32 %v3650_v53, %v1803_v62  ;;  %v1873_v9 = vadd.f32 %v1872_v45, %v1842_v46 }
 0x24c   : > { %v1805_v7 = vadd.f32 %v1804_v18, %v1727_v10  ;;  %v1874_v50 = vadd.f32 %v1873_v9, %v1843_v59 }
 0x24e   : > { %v1806_v28 = vadd.f32 %v1805_v7, %v1730_v57  ;;  %v1875_v3 = vadd.f32 %v1874_v50, %v1844_v54  ;;  %v2272_v19 = vpop.f32.mrb[8].mxu1 }
 0x24f   : > { %v2375_v49 = vpack.i.bf16 %v2272_v19, %v3628_v61  ;;  %v1759_v51 = vpop.f32.mrb[9].mxu1  ;;  %v1849_v61 = vmul.f32 %v1746_v16, %v1746_v16  ;;  %v1854_v11 = vmul.f32 %v2272_v19, %v2272_v19 }
 0x250   : > { %v1807_v60 = vadd.f32 %v3622_v29, %v1806_v28  ;;  %v1876_v58 = vadd.f32 %v1875_v3, %v1845_v12  ;;  %v2371_v21 = vpack.i.bf16 %v1759_v51, %v1695_v43  ;;  %v2273_v17 = vpop.f32.mrb[10].mxu1  ;;  %v1850_v43 = vmul.f32 %v2268_v48, %v2268_v48 }
 0x251   : > { %v2377_v33 = vpack.i.bf16 %v2273_v17, %v3630_v42  ;;  %v1762_v27 = vpop.f32.mrb[11].mxu1  ;;  %v1855_v20 = vmul.f32 %v2273_v17, %v2273_v17 }
 0x252   : > { %v1877_v6 = vadd.f32 %v1876_v58, %v1846_v8  ;;  %v1808_v10 = vadd.f32 %v3625_v55, %v1807_v60  ;;  %v2373_v47 = vpack.i.bf16 %v1762_v27, %v3632_v52  ;;  %2372 = vxpose.xlu0.b32.cont [9/16] (narrow) %v2371_v21, 8  ;;  %v1852_v55 = vmul.f32 %v1759_v51, %v1759_v51 }
 0x253   : > { %v1853_v34 = vmul.f32 %v1762_v27, %v1762_v27 }
 0x254   : > { %v1809_v57 = vadd.f32 %v1808_v10, %v1743_v2  ;;  %v1878_v0 = vadd.f32 %v1877_v6, %v1847_v26 }
 0x256   : > { %v1810_v29 = vadd.f32 %v1809_v57, %v1746_v16  ;;  %v1879_v15 = vadd.f32 %v1878_v0, %v1848_v24  ;;  %2374 = vxpose.xlu0.b32.cont [10/16] (narrow) %v2373_v47, 8 }
 0x258   : > { %v1811_v39 = vadd.f32 %v2268_v48, %v1810_v29  ;;  %v1880_v42 = vadd.f32 %v1879_v15, %v1849_v61 }
 0x25a   : > { %v1812_v35 = vadd.f32 %v2269_v63, %v1811_v39  ;;  %v1881_v31 = vadd.f32 %v1880_v42, %v1850_v43  ;;  %2376 = vxpose.xlu0.b32.cont [11/16] (narrow) %v2375_v49, 8 }
 0x25c   : > { %v1882_v23 = vadd.f32 %v1881_v31, %v1851_v14  ;;  %v1813_v37 = vadd.f32 %v1812_v35, %v1759_v51 }
 0x25e   : > { %v1883_v13 = vadd.f32 %v1882_v23, %v1852_v55  ;;  %v1814_v52 = vadd.f32 %v1813_v37, %v1762_v27  ;;  %2378 = vxpose.xlu0.b32.cont [12/16] (narrow) %v2377_v33, 8 }
 0x260   : > { %v1815_v25 = vadd.f32 %v2272_v19, %v1814_v52  ;;  %v1884_v4 = vadd.f32 %v1883_v13, %v1853_v34 }
 0x262   : > { %v1885_v2 = vadd.f32 %v1884_v4, %v1854_v11  ;;  %v1816_v30 = vadd.f32 %v2273_v17, %v1815_v25 }
 0x264   : > { %v1886_v56 = vadd.f32 %v1885_v2, %v1855_v20 }
 0x26b   : > { %v2276_v48 = vpop.f32.mrb[12].mxu1 }
 0x26c   : > { %v2383_v16 = vpack.i.bf16 %v2276_v48, %v3643_v36  ;;  %v1775_v63 = vpop.f32.mrb[13].mxu1  ;;  %v1858_v18 = vmul.f32 %v2276_v48, %v2276_v48 }
 0x26d   : > { %v2379_v38 = vpack.i.bf16 %v1775_v63, %v3645_v40  ;;  %v1817_v32 = vadd.f32 %v1816_v30, %v1775_v63  ;;  %v1856_v41 = vmul.f32 %v1775_v63, %v1775_v63  ;;  %v2277_v5 = vpop.f32.mrb[14].mxu1 }
 0x26e   : > { %v2385_v22 = vpack.i.bf16 %v2277_v5, %v3650_v53  ;;  %v1778_v44 = vpop.f32.mrb[15].mxu1  ;;  %v1859_v36 = vmul.f32 %v2277_v5, %v2277_v5 }
 0x26f   : > { %v1887_v46 = vadd.f32 %v1886_v56, %v1856_v41  ;;  %v2381_v62 = vpack.i.bf16 %v1778_v44, %v3652_v1  ;;  %v1818_v45 = vadd.f32 %v1817_v32, %v1778_v44  ;;  %v1857_v59 = vmul.f32 %v1778_v44, %v1778_v44  ;;  %2380 = vxpose.xlu0.b32.cont [13/16] (narrow) %v2379_v38, 8 }
 0x271   : > { %v1819_v9 = vadd.f32 %v2276_v48, %v1818_v45  ;;  %v1888_v54 = vadd.f32 %v1887_v46, %v1857_v59 }
 0x273   : > { %v1820_v7 = vadd.f32 %v2277_v5, %v1819_v9  ;;  %v1889_v50 = vadd.f32 %v1888_v54, %v1858_v18  ;;  %2382 = vxpose.xlu0.b32.cont [14/16] (narrow) %v2381_v62, 8 }
 0x275   : > { %v1821_v40 = vrot.slane %v1820_v7, 4  ;;  %v1890_v12 = vadd.f32 %v1889_v50, %v1859_v36 }
 0x277   : > { %v1822_v28 = vadd.f32 %v1821_v40, %v1820_v7  ;;  %v1891_v53 = vrot.slane %v1890_v12, 4  ;;  %2384 = vxpose.xlu0.b32.cont [15/16] (narrow) %v2383_v16, 8 }
 0x279   : > { %v1823_v1 = vrot.slane %v1822_v28, 2  ;;  %v1892_v3 = vadd.f32 %v1891_v53, %v1890_v12 }
 0x27b   : > { %2386 = vxpose.xlu0.b32.end [16/16] (narrow) %v2385_v22, 8  ;;  %v1824_v19 = vadd.f32 %v1823_v1, %v1822_v28  ;;  %v1893_v49 = vrot.slane %v1892_v3, 2 }
 0x27d   : > { %v1825_v51 = vrot.slane %v1824_v19, 1  ;;  %v1894_v8 = vadd.f32 %v1893_v49, %v1892_v3 }
 0x27f   : > { %v1826_v60 = vadd.f32 %v1825_v51, %v1824_v19  ;;  %v1895_v58 = vrot.slane %v1894_v8, 1 }
 0x281   : > { %1827 = vst [vmem:[%s190_s4] sm:$0x1] %v1826_v60  ;;  %v1896_v21 = vadd.f32 %v1895_v58, %v1894_v8 }
 0x283   : > { %1897 = vst [vmem:[%s190_s4 + $0x1] sm:$0x1] %v1896_v21 }
 0x284   : > { %2426 = shalt.err (!%p2423_p5)
}
 0x285   : > { %s2427_s21 = scalar_lea.hbm %s3684_s8, 32  ;;  %s2431_s27 = scalar_lea.hbm %s3766_s3, 64 }
 0x286   : > { %p2428_p6 = scmp.ne.s32.totalorder %s3684_s8, %s2427_s21  ;;  %p2432_p10 = scmp.lt.u32.totalorder %s3684_s8, %s3766_s3 }
 0x287   : > { %p2433_p11 = scmp.lt.u32.totalorder %s2431_s27, %s2427_s21  ;;  %p2435_p13 = scmp.lt.u32.totalorder %s2427_s21, %s3684_s8 }
 0x288   : > { %p2429_p7 = pnand %p2428_p6, %p2595_p4 }
 0x289   : > { %p2434_p12 = por %p2433_p11, %p2432_p10 }
 0x28a   : > { %p2430_p9 = pneg %p2429_p7 }
 0x28b   : > { %p2436_p0 = por %p2435_p13, %p2434_p12 }
 0x28d   : > { %p2437_p1 = pnand %p2436_p0, %p2430_p9 }
 0x28f   : > { %2440 = shalt.err (!%p2437_p1)
}
 0x290   : > { %2288 = dma.vmem_to_hbm [thread:$0]  (%p2595_p4), %s3686_s5, 32, %s3684_s8, %s1977_s9  }
 0x291   : > { %s2117_s4 = sshll.u32 %s3677_s28, 3  ;;  %s2220_s6 = sshll.u32 %s2515_s15, 7 }
 0x292   : > { %s183_s7 = scalar_lea.vmem [#allocation2], %s2117_s4  ;;  %s3715_s19 = scalar_lea.hbm %s3765_s2, %s2220_s6 }
 0x293   : > { %s1993_s10 = sshll.u32 %s183_s7, 4  ;;  %s1972_s5 = scalar_lea.sflag [#allocation3], %s3677_s28  ;;  %s3717_s10 = int_to_ptr.vmem [resolvable:$true] %s1993_s10 }
 0x294   : > { %s2441_s8 = scalar_lea.vmem %s3717_s10, 128  ;;  %s2534_s15 = smov [#allocation2]  }
 0x295   : > { %p2442_p2 = scmp.ne.s32.totalorder %s3717_s10, %s2441_s8  ;;  %s2445_s9 = sshll.u32 %s2534_s15, 4  ;;  %s2446_s9 = int_to_ptr.vmem [resolvable:$false] %s2445_s9 }
 0x296   : > { %s2447_s21 = scalar_lea.vmem %s2446_s9, 256  ;;  %p2448_p6 = scmp.lt.s32.totalorder %s3717_s10, %s2446_s9 }
 0x297   : > { %p2443_p3 = pnand %p2442_p2, %p2595_p4  ;;  %p2449_p7 = scmp.lt.s32.totalorder %s2447_s21, %s2441_s8 }
 0x299   : > { %p2444_p5 = pneg %p2443_p3  ;;  %p2450_p9 = por %p2449_p7, %p2448_p6 }
 0x29b   : > { %p2451_p10 = pnand %p2450_p9, %p2444_p5 }
 0x2bf   : > { %v2387_v17 = vpop.trf.xlu0 }
 0x2c0   : > { %v2391_v33 = vunpack.i.h.bf16 %v2387_v17  ;;  %v2388_v27 = vunpack.i.l.bf16 %v2387_v17 }
 0x2c2   : > { %v2219_v26 = vpack.c.bf16 %v2391_v33, %v2388_v27 }
 0x2c4   : > { %1970 = vst [vmem:[%s183_s7] sm:$0xff] %v2219_v26 }
 0x2c5   : > { %2454 = shalt.err (!%p2451_p10)
}
 0x2c6   : > { %s2455_s28 = scalar_lea.hbm %s3715_s19, 128  ;;  %s2459_s27 = scalar_lea.hbm %s3765_s2, 256 }
 0x2c7   : > { %p2456_p11 = scmp.ne.s32.totalorder %s3715_s19, %s2455_s28  ;;  %p2460_p0 = scmp.lt.u32.totalorder %s3715_s19, %s3765_s2 }
 0x2c8   : > { %p2461_p1 = scmp.lt.u32.totalorder %s2459_s27, %s2455_s28  ;;  %p2463_p3 = scmp.lt.u32.totalorder %s2455_s28, %s3715_s19 }
 0x2c9   : > { %p2457_p12 = pnand %p2456_p11, %p2595_p4 }
 0x2ca   : > { %p2462_p2 = por %p2461_p1, %p2460_p0 }
 0x2cb   : > { %p2458_p13 = pneg %p2457_p12 }
 0x2cc   : > { %p2464_p5 = por %p2463_p3, %p2462_p2 }
 0x2ce   : > { %p2465_p6 = pnand %p2464_p5, %p2458_p13 }
 0x2d0   : > { %2468 = shalt.err (!%p2465_p6)
}
 0x2d1   : > { %2287 = dma.vmem_to_hbm [thread:$0]  (%p2595_p4), %s3717_s10, 128, %s3715_s19, %s1972_s5  }
 0x2d2 PF: > { %p2298_p7 = scmp.ge.s32.totalorder %s2523_s17, 2  ;;  %s2019_s4 = sand.u32 1, %s2503_s12  }
 0x2d3   : > { %s2020_s6 = scalar_lea.sflag [#allocation3], %s2019_s4 }
 0x2d4   : > { %p2292_p9 = pnand %p2298_p7, %p2602_p8 }
 0x2d6   : > { %2494 = dma.done.wait (!%p2292_p9), %s2020_s6, 128  }
 0x2d7   : > { %2496 = vsyncadd (!%p2292_p9), %s2020_s6, 4294967168  ;;  %s2029_s7 = scalar_lea.sflag [#allocation5], %s2019_s4 }
 0x2d8   : > { %2498 = dma.done.wait (!%p2292_p9), %s2029_s7, 32  }
 0x2d9   : > { %2500 = vsyncadd (!%p2292_p9), %s2029_s7, 4294967264  ;;  %s20_s17 = sadd.s32 1, %s2523_s17   ;;  %s3773_s12 = smov %s2507_s13 }
 0x2da   : > { %p17_p10 = scmp.ge.s32.totalorder %s20_s17, 4   ;;  %s3774_s13 = smov %s2511_s14 }
 0x2db   : > { %s3775_s14 = smov %s2608_s25  ;;  %s3776_s15 = smov %s2519_s16 }
 0x2dc   : > { %s3777_s16 = smov %s3779_s20  ;;  %19 = sbr.rel (!%p17_p10) target bundleno = 6 (0x6), region = 81 }
 0x2e3   :  { %2034 = vsyncpa [#allocation3], 1 }
 0x2e4   :  { %2036 = vsyncpa [#allocation3 + $0x1], 1 }
 0x2e5   :  { %2037 = vsyncpa [#allocation5], 1 }
 0x2e6   :  { %2039 = vsyncpa [#allocation5 + $0x1], 1 }

</bundles_post_ra>
